<compile_context>
chip_gen: v7x
topology: tpu7x:2x2x1
jax: 0.10.0
libtpu: 0.0.40
codegen_flags: <defaults>
</compile_context>

<pallas_src>
import jax
import jax.numpy as jnp
from jax.experimental import pallas as pl
from jax.experimental.pallas import tpu as pltpu


# ---------------------------------------------------------------------------
# Pallas kernel
# ---------------------------------------------------------------------------

def _make_conv_kernel(w, cin_p, cout_p, k, band_rows, n_bands):
    """k x k 'same' conv + bias on a channels-last row band of the image."""
    rad = k // 2
    bhw = band_rows * w            # flat pixels per output band
    rad_w = rad * w                # flat pixels per halo
    npad = (band_rows + 2 * rad) * w

    def kernel(x_ref, w_ref, b_ref, o_ref, xpad_ref, acc_ref):
        hb = pl.program_id(1)
        body_start = hb * bhw
        if bhw % 8 == 0:
            body_start = pl.multiple_of(body_start, 8)

        # --- build the zero-padded (npad, Cin_p) band in VMEM scratch ----------
        xpad_ref[rad_w:rad_w + bhw] = x_ref[0, pl.ds(body_start, bhw)]
        if rad > 0:
            @pl.when(hb == 0)
            def _():
                xpad_ref[0:rad_w] = jnp.zeros((rad_w, cin_p), x_ref.dtype)

            @pl.when(hb > 0)
            def _():
                xpad_ref[0:rad_w] = x_ref[0, pl.ds(body_start - rad_w, rad_w)]

            @pl.when(hb == n_bands - 1)
            def _():
                xpad_ref[rad_w + bhw:npad] = jnp.zeros((rad_w, cin_p), x_ref.dtype)

            @pl.when(hb < n_bands - 1)
            def _():
                xpad_ref[rad_w + bhw:npad] = x_ref[0, pl.ds(body_start + bhw, rad_w)]

        center = xpad_ref[...]                                   # (npad, Cin_p)

        # --- hoisted column shifts: k-1 rolls + masks, reused across all dy ----
        cols = {rad: center}
        if k > 1:
            col = jax.lax.broadcasted_iota(jnp.int32, (npad, 1), 0) % w
            for dx in range(k):
                if dx == rad:
                    continue
                sx = dx - rad
                shifted = pltpu.roll(center, (-sx) % npad, axis=0)
                mask = (col < (w - sx)) if sx > 0 else (col >= (-sx))
                cols[dx] = jnp.where(mask, shifted, jnp.zeros((), center.dtype))

        # --- k^2 accumulating MXU matmuls into the f32 VMEM accumulator --------
        t = 0
        for dy in range(k):
            row_off = dy * w                                     # free row slice
            for dx in range(k):
                src = cols[dx][row_off:row_off + bhw]            # (bhw, Cin_p)
                contrib = jnp.dot(src, w_ref[dy * k + dx],
                                  preferred_element_type=jnp.float32)
                if t == 0:
                    acc_ref[...] = contrib
                else:
                    acc_ref[...] += contrib
                t += 1

        # --- fused bias add + lane-dense store ----------------------------------
        o_ref[0] = (acc_ref[...] + b_ref[...]).astype(o_ref.dtype)

    return kernel


# ---------------------------------------------------------------------------
# Wrapper helpers
# ---------------------------------------------------------------------------

def _round_up(x, m):
    return ((x + m - 1) // m) * m


def _vmem_limit_bytes():
    """Per-generation VMEM limit with headroom for double buffers / scratch."""
    cap = None
    get_info = getattr(pltpu, "get_tpu_info", None)
    if get_info is not None:
        try:
            cap = getattr(get_info(), "vmem_capacity_bytes", None)
        except Exception:
            cap = None
    if not cap:
        return 64 * 1024 * 1024      # safe fallback on every generation
    # ~48 MiB on v7x (64 MiB/TC), ~96-112 MiB on v5e/v6e (128 MiB).
    return int(min(cap * 3 // 4, 112 * 1024 * 1024))


def _pick_band_rows(h):
    for cand in (128, 64, 32, 16, 8):
        if h % cand == 0:
            return cand
    return h


# ---------------------------------------------------------------------------
# NHWC-native entry point (no activation transposes)
# ---------------------------------------------------------------------------

def conv2d_pallas_nhwc(x_nhwc, weight, bias=None, *, compute_dtype=None,
                       band_rows=None):
    """EDM Conv2d.forward (default path) on NHWC activations.

    x_nhwc: (B, H, W, Cin); weight: (Cout, Cin, k, k) with k odd; bias: (Cout,) or None.
    Returns (B, H, W, Cout) in the compute dtype.
    """
    b, h, w, cin = x_nhwc.shape
    cout, cin_w, kh, kw = weight.shape
    assert cin_w == cin and kh == kw and kh % 2 == 1, (weight.shape, cin)
    k = kh
    rad = k // 2
    cdt = jnp.dtype(compute_dtype) if compute_dtype is not None else x_nhwc.dtype

    cin_p = _round_up(cin, 128)       # lane-aligned contraction operand
    cout_p = _round_up(cout, 128)     # lane-dense output store

    if band_rows is None:
        band_rows = _pick_band_rows(h)
    assert h % band_rows == 0 and band_rows >= rad, (h, band_rows, rad)
    n_bands = h // band_rows

    # Channels-last flat (B, H*W, Cin_p); weight OIHW -> (k*k, Cin_p, Cout_p).
    x = x_nhwc.astype(cdt).reshape(b, h * w, cin)
    if cin_p != cin:
        x = jnp.pad(x, ((0, 0), (0, 0), (0, cin_p - cin)))
    w_taps = jnp.transpose(weight, (2, 3, 1, 0)).reshape(k * k, cin, cout)
    w_taps = w_taps.astype(cdt)                                 # matches w.to(x.dtype)
    if cin_p != cin or cout_p != cout:
        w_taps = jnp.pad(w_taps, ((0, 0), (0, cin_p - cin), (0, cout_p - cout)))
    bvec = jnp.zeros((cout_p,), jnp.float32)
    if bias is not None:
        bvec = bvec.at[:cout].set(bias.astype(jnp.float32))
    bvec = bvec.reshape(1, cout_p)

    out = pl.pallas_call(
        _make_conv_kernel(w, cin_p, cout_p, k, band_rows, n_bands),
        out_shape=jax.ShapeDtypeStruct((b, h * w, cout_p), cdt),
        grid=(b, n_bands),
        in_specs=[
            # Full image resident across bands (constant index along band axis).
            pl.BlockSpec((1, h * w, cin_p), lambda i, j: (i, 0, 0)),
            pl.BlockSpec((k * k, cin_p, cout_p), lambda i, j: (0, 0, 0)),
            pl.BlockSpec((1, cout_p), lambda i, j: (0, 0)),
        ],
        out_specs=pl.BlockSpec((1, band_rows * w, cout_p), lambda i, j: (i, j, 0)),
        scratch_shapes=[
            pltpu.VMEM(((band_rows + 2 * rad) * w, cin_p), cdt),   # padded halo band
            pltpu.VMEM((band_rows * w, cout_p), jnp.float32),      # f32 accumulator
        ],
        compiler_params=pltpu.CompilerParams(
            dimension_semantics=("parallel", "parallel"),
            vmem_limit_bytes=_vmem_limit_bytes(),
        ),
    )(x, w_taps, bvec)

    out = out.reshape(b, h, w, cout_p)
    if cout_p != cout:
        out = out[..., :cout]
    return out


# ---------------------------------------------------------------------------
# NCHW adapter (PyTorch layout glue; compute is entirely in the Pallas kernel)
# ---------------------------------------------------------------------------

def conv2d_pallas(x_nchw, weight, bias=None, **kwargs):
    # TODO(synk): in the full EDM network keep activations channels-last so these
    # boundary transposes disappear; they exist only to match the NCHW interface.
    y = conv2d_pallas_nhwc(jnp.transpose(x_nchw, (0, 2, 3, 1)), weight, bias, **kwargs)
    return jnp.transpose(y, (0, 3, 1, 2))


# ---------------------------------------------------------------------------
# Pure-JAX reference (correctness check only)
# ---------------------------------------------------------------------------

def reference_conv2d(x, w, b):
    pad = w.shape[-1] // 2
    y = jax.lax.conv_general_dilated(
        x, w, window_strides=(1, 1), padding=((pad, pad), (pad, pad)),
        dimension_numbers=("NCHW", "OIHW", "NCHW"))
    if b is not None:
        y = y + b[None, :, None, None]
    return y


# ---------------------------------------------------------------------------
# Main
# ---------------------------------------------------------------------------

if __name__ == "__main__":
    B, Cin, Cout, H, W, K = 2, 4, 8, 16, 16, 3

    key = jax.random.PRNGKey(0)
    k1, k2, k3, k4, k5 = jax.random.split(key, 5)

    # kaiming_normal init (module default, init_weight=1). NOTE: the module's
    # default init_bias=0 makes the bias exactly zero; a nonzero bias is used
    # here to exercise the fused bias-add path.
    w3 = jnp.sqrt(1.0 / (Cin * K * K)) * jax.random.normal(
        k1, (Cout, Cin, K, K), jnp.float32)
    b3 = 0.1 * jax.random.normal(k2, (Cout,), jnp.float32)
    w1 = jnp.sqrt(1.0 / Cin) * jax.random.normal(
        k3, (Cout, Cin, 1, 1), jnp.float32)          # kernel=1 (skip-conv config)
    b1 = 0.1 * jax.random.normal(k4, (Cout,), jnp.float32)
    x = jax.random.normal(k5, (B, Cin, H, W), jnp.float32)

    # 3x3 conv, multi-band (exercises the halo copies / pl.when edge paths).
    out3_banded = jax.block_until_ready(conv2d_pallas(x, w3, b3, band_rows=8))
    # 3x3 conv, single band (default band picker -> nb == 1).
    out3_full = jax.block_until_ready(conv2d_pallas(x, w3, b3))
    # 1x1 conv (padding 0, no halo / no rolls).
    out1 = jax.block_until_ready(conv2d_pallas(x, w1, b1))

    ref3 = reference_conv2d(x, w3, b3)
    ref1 = reference_conv2d(x, w1, b1)
    err = max(float(jnp.max(jnp.abs(out3_banded - ref3))),
              float(jnp.max(jnp.abs(out3_full - ref3))),
              float(jnp.max(jnp.abs(out1 - ref1))))

    assert out3_banded.shape == (B, Cout, H, W), out3_banded.shape
    assert out1.shape == (B, Cout, H, W), out1.shape
    assert err < 1e-3, f"max abs err {err}"

    # bf16 MXU fast path (module semantics: w.to(x.dtype)); loose tolerance.
    out3_bf16 = jax.block_until_ready(
        conv2d_pallas(x.astype(jnp.bfloat16), w3, b3, band_rows=8)
    ).astype(jnp.float32)
    err_bf16 = float(jnp.max(jnp.abs(out3_bf16 - ref3)))
    assert err_bf16 < 0.2, f"bf16 max abs err {err_bf16}"

    print("KERNEL_OK")
</pallas_src>

<mosaic_0001>
module attributes {stable_mosaic.version = 11 : i64} {
  func.func @kernel(%arg0: i32, %arg1: i32, %arg2: memref<1x256x128xf32, #tpu.memory_space<vmem>>, %arg3: memref<9x128x128xf32, #tpu.memory_space<vmem>>, %arg4: memref<1x128xf32, #tpu.memory_space<vmem>>, %arg5: memref<1x128x128xf32, #tpu.memory_space<vmem>>, %arg6: memref<160x128xf32, #tpu.memory_space<vmem>>, %arg7: memref<128x128xf32, #tpu.memory_space<vmem>>) attributes {dimension_semantics = [#tpu.dimension_semantics<parallel>, #tpu.dimension_semantics<parallel>], iteration_bounds = array<i64: 2, 2>, scalar_prefetch = 0 : i64, scratch_operands = 2 : i64, tpu.core_type = #tpu.core_type<tc>, window_params = [{transform_indices = @transform_0, window_bounds = array<i64: 1, 256, 128>}, {pipeline_mode = #tpu.pipeline_mode<synchronous>, transform_indices = @transform_1, window_bounds = array<i64: 9, 128, 128>}, {pipeline_mode = #tpu.pipeline_mode<synchronous>, transform_indices = @transform_2, window_bounds = array<i64: 1, 128>}, {transform_indices = @transform_3, window_bounds = array<i64: 1, 128, 128>}]} {
    %c128_i32 = arith.constant 128 : i32
    %0 = arith.muli %arg1, %c128_i32 : i32
    %1 = tpu.assume_multiple %0, 8 : i32
    %c0 = arith.constant 0 : index
    %2 = arith.index_cast %1 : i32 to index
    %c0_0 = arith.constant 0 : index
    %3 = vector.load %arg2[%c0, %2, %c0_0] : memref<1x256x128xf32, #tpu.memory_space<vmem>>, vector<1x128x128xf32>
    %4 = vector.shape_cast %3 : vector<1x128x128xf32> to vector<128x128xf32>
    %c16 = arith.constant 16 : index
    %c0_1 = arith.constant 0 : index
    %5 = vector.load %arg6[%c16, %c0_1] : memref<160x128xf32, #tpu.memory_space<vmem>>, vector<128x128xf32>
    tpu.vector_store %arg6[%c16, %c0_1], %4 {strides = array<i32>} : memref<160x128xf32, #tpu.memory_space<vmem>>, vector<128x128xf32>,
    %c0_i32 = arith.constant 0 : i32
    %6 = arith.cmpi eq, %arg1, %c0_i32 : i32
    %7 = arith.extui %6 : i1 to i32
    %c0_i32_2 = arith.constant 0 : i32
    %8 = arith.cmpi ne, %7, %c0_i32_2 : i32
    scf.if %8 {
      %cst_87 = arith.constant 0.000000e+00 : f32
      %118 = vector.broadcast %cst_87 : f32 to vector<16x128xf32>
      %c0_88 = arith.constant 0 : index
      %c0_89 = arith.constant 0 : index
      %119 = vector.load %arg6[%c0_88, %c0_89] : memref<160x128xf32, #tpu.memory_space<vmem>>, vector<16x128xf32>
      tpu.vector_store %arg6[%c0_88, %c0_89], %118 {strides = array<i32>} : memref<160x128xf32, #tpu.memory_space<vmem>>, vector<16x128xf32>,
    } else {
    }
    %c0_i32_3 = arith.constant 0 : i32
    %9 = arith.cmpi sgt, %arg1, %c0_i32_3 : i32
    %10 = arith.extui %9 : i1 to i32
    %c0_i32_4 = arith.constant 0 : i32
    %11 = arith.cmpi ne, %10, %c0_i32_4 : i32
    scf.if %11 {
      %c16_i32_87 = arith.constant 16 : i32
      %118 = arith.subi %1, %c16_i32_87 : i32
      %c0_88 = arith.constant 0 : index
      %119 = arith.index_cast %118 : i32 to index
      %c0_89 = arith.constant 0 : index
      %120 = vector.load %arg2[%c0_88, %119, %c0_89] : memref<1x256x128xf32, #tpu.memory_space<vmem>>, vector<1x16x128xf32>
      %121 = vector.shape_cast %120 : vector<1x16x128xf32> to vector<16x128xf32>
      %c0_90 = arith.constant 0 : index
      %c0_91 = arith.constant 0 : index
      %122 = vector.load %arg6[%c0_90, %c0_91] : memref<160x128xf32, #tpu.memory_space<vmem>>, vector<16x128xf32>
      tpu.vector_store %arg6[%c0_90, %c0_91], %121 {strides = array<i32>} : memref<160x128xf32, #tpu.memory_space<vmem>>, vector<16x128xf32>,
    } else {
    }
    %c1_i32 = arith.constant 1 : i32
    %12 = arith.cmpi eq, %arg1, %c1_i32 : i32
    %13 = arith.extui %12 : i1 to i32
    %c0_i32_5 = arith.constant 0 : i32
    %14 = arith.cmpi ne, %13, %c0_i32_5 : i32
    scf.if %14 {
      %cst_87 = arith.constant 0.000000e+00 : f32
      %118 = vector.broadcast %cst_87 : f32 to vector<16x128xf32>
      %c144 = arith.constant 144 : index
      %c0_88 = arith.constant 0 : index
      %119 = vector.load %arg6[%c144, %c0_88] : memref<160x128xf32, #tpu.memory_space<vmem>>, vector<16x128xf32>
      tpu.vector_store %arg6[%c144, %c0_88], %118 {strides = array<i32>} : memref<160x128xf32, #tpu.memory_space<vmem>>, vector<16x128xf32>,
    } else {
    }
    %c1_i32_6 = arith.constant 1 : i32
    %15 = arith.cmpi slt, %arg1, %c1_i32_6 : i32
    %16 = arith.extui %15 : i1 to i32
    %c0_i32_7 = arith.constant 0 : i32
    %17 = arith.cmpi ne, %16, %c0_i32_7 : i32
    scf.if %17 {
      %c128_i32_87 = arith.constant 128 : i32
      %118 = arith.addi %1, %c128_i32_87 : i32
      %c0_88 = arith.constant 0 : index
      %119 = arith.index_cast %118 : i32 to index
      %c0_89 = arith.constant 0 : index
      %120 = vector.load %arg2[%c0_88, %119, %c0_89] : memref<1x256x128xf32, #tpu.memory_space<vmem>>, vector<1x16x128xf32>
      %121 = vector.shape_cast %120 : vector<1x16x128xf32> to vector<16x128xf32>
      %c144 = arith.constant 144 : index
      %c0_90 = arith.constant 0 : index
      %122 = vector.load %arg6[%c144, %c0_90] : memref<160x128xf32, #tpu.memory_space<vmem>>, vector<16x128xf32>
      tpu.vector_store %arg6[%c144, %c0_90], %121 {strides = array<i32>} : memref<160x128xf32, #tpu.memory_space<vmem>>, vector<16x128xf32>,
    } else {
    }
    %c0_8 = arith.constant 0 : index
    %c0_9 = arith.constant 0 : index
    %18 = vector.load %arg6[%c0_8, %c0_9] : memref<160x128xf32, #tpu.memory_space<vmem>>, vector<160x128xf32>
    %19 = tpu.iota {dimensions = array<i32: 0>} : vector<160x1xi32>
    %c16_i32 = arith.constant 16 : i32
    %c0_i32_10 = arith.constant 0 : i32
    %20 = arith.cmpi eq, %c16_i32, %c0_i32_10 : i32
    %c1_i32_11 = arith.constant 1 : i32
    %21 = arith.select %20, %c1_i32_11, %c16_i32 : i32
    %22 = vector.broadcast %21 : i32 to vector<160x1xi32>
    %23 = arith.remsi %19, %22 : vector<160x1xi32>
    %c0_i32_12 = arith.constant 0 : i32
    %24 = vector.broadcast %c0_i32_12 : i32 to vector<160x1xi32>
    %25 = arith.cmpi ne, %23, %24 : vector<160x1xi32>
    %c0_i32_13 = arith.constant 0 : i32
    %26 = vector.broadcast %c0_i32_13 : i32 to vector<160x1xi32>
    %27 = arith.cmpi slt, %23, %26 : vector<160x1xi32>
    %c0_i32_14 = arith.constant 0 : i32
    %28 = arith.cmpi slt, %21, %c0_i32_14 : i32
    %29 = vector.broadcast %28 : i1 to vector<160x1xi1>
    %30 = vector.broadcast %29 : vector<160x1xi1> to vector<160x1xi1>
    %31 = arith.xori %27, %30 : vector<160x1xi1>
    %32 = arith.andi %31, %25 : vector<160x1xi1>
    %33 = vector.broadcast %21 : i32 to vector<160x1xi32>
    %34 = arith.addi %23, %33 : vector<160x1xi32>
    %35 = arith.select %32, %34, %23 : vector<160x1xi1>, vector<160x1xi32>
    %c1_i32_15 = arith.constant 1 : i32
    %36 = tpu.dynamic_rotate %18 by %c1_i32_15 dim 0 : vector<160x128xf32>, i32 -> vector<160x128xf32>
    %c1_i32_16 = arith.constant 1 : i32
    %37 = vector.broadcast %c1_i32_16 : i32 to vector<160x1xi32>
    %38 = arith.cmpi sge, %35, %37 : vector<160x1xi32>
    %cst = arith.constant 0.000000e+00 : f32
    %39 = vector.shape_cast %38 : vector<160x1xi1> to vector<160x1xi1>
    %40 = vector.broadcast %39 : vector<160x1xi1> to vector<160x128xi1>
    %41 = vector.broadcast %cst : f32 to vector<160x128xf32>
    %42 = arith.select %40, %36, %41 : vector<160x128xi1>, vector<160x128xf32>
    %c159_i32 = arith.constant 159 : i32
    %43 = tpu.dynamic_rotate %18 by %c159_i32 dim 0 : vector<160x128xf32>, i32 -> vector<160x128xf32>
    %c15_i32 = arith.constant 15 : i32
    %44 = vector.broadcast %c15_i32 : i32 to vector<160x1xi32>
    %45 = arith.cmpi slt, %35, %44 : vector<160x1xi32>
    %cst_17 = arith.constant 0.000000e+00 : f32
    %46 = vector.shape_cast %45 : vector<160x1xi1> to vector<160x1xi1>
    %47 = vector.broadcast %46 : vector<160x1xi1> to vector<160x128xi1>
    %48 = vector.broadcast %cst_17 : f32 to vector<160x128xf32>
    %49 = arith.select %47, %43, %48 : vector<160x128xi1>, vector<160x128xf32>
    %50 = vector.extract_strided_slice %42 {offsets = [0, 0], sizes = [128, 128], strides = [1, 1]} : vector<160x128xf32> to vector<128x128xf32>
    %c0_18 = arith.constant 0 : index
    %c0_19 = arith.constant 0 : index
    %c0_20 = arith.constant 0 : index
    %51 = vector.load %arg3[%c0_18, %c0_19, %c0_20] : memref<9x128x128xf32, #tpu.memory_space<vmem>>, vector<1x128x128xf32>
    %52 = vector.shape_cast %51 : vector<1x128x128xf32> to vector<128x128xf32>
    %cst_21 = arith.constant dense<0.000000e+00> : vector<128x128xf32>
    %53 = tpu.matmul %50, %52, %cst_21 {dimension_numbers = #tpu.dot_dimension_numbers<[1], [0], [0], [1], [0, 0, 1, 1], [], []>} : vector<128x128xf32>, vector<128x128xf32>, vector<128x128xf32> -> vector<128x128xf32>
    %c0_22 = arith.constant 0 : index
    %c0_23 = arith.constant 0 : index
    %54 = vector.load %arg7[%c0_22, %c0_23] : memref<128x128xf32, #tpu.memory_space<vmem>>, vector<128x128xf32>
    tpu.vector_store %arg7[%c0_22, %c0_23], %53 {strides = array<i32>} : memref<128x128xf32, #tpu.memory_space<vmem>>, vector<128x128xf32>,
    %55 = vector.extract_strided_slice %18 {offsets = [0, 0], sizes = [128, 128], strides = [1, 1]} : vector<160x128xf32> to vector<128x128xf32>
    %c1 = arith.constant 1 : index
    %c0_24 = arith.constant 0 : index
    %c0_25 = arith.constant 0 : index
    %56 = vector.load %arg3[%c1, %c0_24, %c0_25] : memref<9x128x128xf32, #tpu.memory_space<vmem>>, vector<1x128x128xf32>
    %57 = vector.shape_cast %56 : vector<1x128x128xf32> to vector<128x128xf32>
    %cst_26 = arith.constant dense<0.000000e+00> : vector<128x128xf32>
    %58 = tpu.matmul %55, %57, %cst_26 {dimension_numbers = #tpu.dot_dimension_numbers<[1], [0], [0], [1], [0, 0, 1, 1], [], []>} : vector<128x128xf32>, vector<128x128xf32>, vector<128x128xf32> -> vector<128x128xf32>
    %c0_27 = arith.constant 0 : index
    %c0_28 = arith.constant 0 : index
    %59 = vector.load %arg7[%c0_27, %c0_28] : memref<128x128xf32, #tpu.memory_space<vmem>>, vector<128x128xf32>
    %60 = arith.addf %59, %58 : vector<128x128xf32>
    %c0_29 = arith.constant 0 : index
    %c0_30 = arith.constant 0 : index
    %61 = vector.load %arg7[%c0_29, %c0_30] : memref<128x128xf32, #tpu.memory_space<vmem>>, vector<128x128xf32>
    tpu.vector_store %arg7[%c0_29, %c0_30], %60 {strides = array<i32>} : memref<128x128xf32, #tpu.memory_space<vmem>>, vector<128x128xf32>,
    %62 = vector.extract_strided_slice %49 {offsets = [0, 0], sizes = [128, 128], strides = [1, 1]} : vector<160x128xf32> to vector<128x128xf32>
    %c2 = arith.constant 2 : index
    %c0_31 = arith.constant 0 : index
    %c0_32 = arith.constant 0 : index
    %63 = vector.load %arg3[%c2, %c0_31, %c0_32] : memref<9x128x128xf32, #tpu.memory_space<vmem>>, vector<1x128x128xf32>
    %64 = vector.shape_cast %63 : vector<1x128x128xf32> to vector<128x128xf32>
    %cst_33 = arith.constant dense<0.000000e+00> : vector<128x128xf32>
    %65 = tpu.matmul %62, %64, %cst_33 {dimension_numbers = #tpu.dot_dimension_numbers<[1], [0], [0], [1], [0, 0, 1, 1], [], []>} : vector<128x128xf32>, vector<128x128xf32>, vector<128x128xf32> -> vector<128x128xf32>
    %c0_34 = arith.constant 0 : index
    %c0_35 = arith.constant 0 : index
    %66 = vector.load %arg7[%c0_34, %c0_35] : memref<128x128xf32, #tpu.memory_space<vmem>>, vector<128x128xf32>
    %67 = arith.addf %66, %65 : vector<128x128xf32>
    %c0_36 = arith.constant 0 : index
    %c0_37 = arith.constant 0 : index
    %68 = vector.load %arg7[%c0_36, %c0_37] : memref<128x128xf32, #tpu.memory_space<vmem>>, vector<128x128xf32>
    tpu.vector_store %arg7[%c0_36, %c0_37], %67 {strides = array<i32>} : memref<128x128xf32, #tpu.memory_space<vmem>>, vector<128x128xf32>,
    %69 = vector.extract_strided_slice %42 {offsets = [16, 0], sizes = [128, 128], strides = [1, 1]} : vector<160x128xf32> to vector<128x128xf32>
    %c3 = arith.constant 3 : index
    %c0_38 = arith.constant 0 : index
    %c0_39 = arith.constant 0 : index
    %70 = vector.load %arg3[%c3, %c0_38, %c0_39] : memref<9x128x128xf32, #tpu.memory_space<vmem>>, vector<1x128x128xf32>
    %71 = vector.shape_cast %70 : vector<1x128x128xf32> to vector<128x128xf32>
    %cst_40 = arith.constant dense<0.000000e+00> : vector<128x128xf32>
    %72 = tpu.matmul %69, %71, %cst_40 {dimension_numbers = #tpu.dot_dimension_numbers<[1], [0], [0], [1], [0, 0, 1, 1], [], []>} : vector<128x128xf32>, vector<128x128xf32>, vector<128x128xf32> -> vector<128x128xf32>
    %c0_41 = arith.constant 0 : index
    %c0_42 = arith.constant 0 : index
    %73 = vector.load %arg7[%c0_41, %c0_42] : memref<128x128xf32, #tpu.memory_space<vmem>>, vector<128x128xf32>
    %74 = arith.addf %73, %72 : vector<128x128xf32>
    %c0_43 = arith.constant 0 : index
    %c0_44 = arith.constant 0 : index
    %75 = vector.load %arg7[%c0_43, %c0_44] : memref<128x128xf32, #tpu.memory_space<vmem>>, vector<128x128xf32>
    tpu.vector_store %arg7[%c0_43, %c0_44], %74 {strides = array<i32>} : memref<128x128xf32, #tpu.memory_space<vmem>>, vector<128x128xf32>,
    %76 = vector.extract_strided_slice %18 {offsets = [16, 0], sizes = [128, 128], strides = [1, 1]} : vector<160x128xf32> to vector<128x128xf32>
    %c4 = arith.constant 4 : index
    %c0_45 = arith.constant 0 : index
    %c0_46 = arith.constant 0 : index
    %77 = vector.load %arg3[%c4, %c0_45, %c0_46] : memref<9x128x128xf32, #tpu.memory_space<vmem>>, vector<1x128x128xf32>
    %78 = vector.shape_cast %77 : vector<1x128x128xf32> to vector<128x128xf32>
    %cst_47 = arith.constant dense<0.000000e+00> : vector<128x128xf32>
    %79 = tpu.matmul %76, %78, %cst_47 {dimension_numbers = #tpu.dot_dimension_numbers<[1], [0], [0], [1], [0, 0, 1, 1], [], []>} : vector<128x128xf32>, vector<128x128xf32>, vector<128x128xf32> -> vector<128x128xf32>
    %c0_48 = arith.constant 0 : index
    %c0_49 = arith.constant 0 : index
    %80 = vector.load %arg7[%c0_48, %c0_49] : memref<128x128xf32, #tpu.memory_space<vmem>>, vector<128x128xf32>
    %81 = arith.addf %80, %79 : vector<128x128xf32>
    %c0_50 = arith.constant 0 : index
    %c0_51 = arith.constant 0 : index
    %82 = vector.load %arg7[%c0_50, %c0_51] : memref<128x128xf32, #tpu.memory_space<vmem>>, vector<128x128xf32>
    tpu.vector_store %arg7[%c0_50, %c0_51], %81 {strides = array<i32>} : memref<128x128xf32, #tpu.memory_space<vmem>>, vector<128x128xf32>,
    %83 = vector.extract_strided_slice %49 {offsets = [16, 0], sizes = [128, 128], strides = [1, 1]} : vector<160x128xf32> to vector<128x128xf32>
    %c5 = arith.constant 5 : index
    %c0_52 = arith.constant 0 : index
    %c0_53 = arith.constant 0 : index
    %84 = vector.load %arg3[%c5, %c0_52, %c0_53] : memref<9x128x128xf32, #tpu.memory_space<vmem>>, vector<1x128x128xf32>
    %85 = vector.shape_cast %84 : vector<1x128x128xf32> to vector<128x128xf32>
    %cst_54 = arith.constant dense<0.000000e+00> : vector<128x128xf32>
    %86 = tpu.matmul %83, %85, %cst_54 {dimension_numbers = #tpu.dot_dimension_numbers<[1], [0], [0], [1], [0, 0, 1, 1], [], []>} : vector<128x128xf32>, vector<128x128xf32>, vector<128x128xf32> -> vector<128x128xf32>
    %c0_55 = arith.constant 0 : index
    %c0_56 = arith.constant 0 : index
    %87 = vector.load %arg7[%c0_55, %c0_56] : memref<128x128xf32, #tpu.memory_space<vmem>>, vector<128x128xf32>
    %88 = arith.addf %87, %86 : vector<128x128xf32>
    %c0_57 = arith.constant 0 : index
    %c0_58 = arith.constant 0 : index
    %89 = vector.load %arg7[%c0_57, %c0_58] : memref<128x128xf32, #tpu.memory_space<vmem>>, vector<128x128xf32>
    tpu.vector_store %arg7[%c0_57, %c0_58], %88 {strides = array<i32>} : memref<128x128xf32, #tpu.memory_space<vmem>>, vector<128x128xf32>,
    %90 = vector.extract_strided_slice %42 {offsets = [32, 0], sizes = [128, 128], strides = [1, 1]} : vector<160x128xf32> to vector<128x128xf32>
    %c6 = arith.constant 6 : index
    %c0_59 = arith.constant 0 : index
    %c0_60 = arith.constant 0 : index
    %91 = vector.load %arg3[%c6, %c0_59, %c0_60] : memref<9x128x128xf32, #tpu.memory_space<vmem>>, vector<1x128x128xf32>
    %92 = vector.shape_cast %91 : vector<1x128x128xf32> to vector<128x128xf32>
    %cst_61 = arith.constant dense<0.000000e+00> : vector<128x128xf32>
    %93 = tpu.matmul %90, %92, %cst_61 {dimension_numbers = #tpu.dot_dimension_numbers<[1], [0], [0], [1], [0, 0, 1, 1], [], []>} : vector<128x128xf32>, vector<128x128xf32>, vector<128x128xf32> -> vector<128x128xf32>
    %c0_62 = arith.constant 0 : index
    %c0_63 = arith.constant 0 : index
    %94 = vector.load %arg7[%c0_62, %c0_63] : memref<128x128xf32, #tpu.memory_space<vmem>>, vector<128x128xf32>
    %95 = arith.addf %94, %93 : vector<128x128xf32>
    %c0_64 = arith.constant 0 : index
    %c0_65 = arith.constant 0 : index
    %96 = vector.load %arg7[%c0_64, %c0_65] : memref<128x128xf32, #tpu.memory_space<vmem>>, vector<128x128xf32>
    tpu.vector_store %arg7[%c0_64, %c0_65], %95 {strides = array<i32>} : memref<128x128xf32, #tpu.memory_space<vmem>>, vector<128x128xf32>,
    %97 = vector.extract_strided_slice %18 {offsets = [32, 0], sizes = [128, 128], strides = [1, 1]} : vector<160x128xf32> to vector<128x128xf32>
    %c7 = arith.constant 7 : index
    %c0_66 = arith.constant 0 : index
    %c0_67 = arith.constant 0 : index
    %98 = vector.load %arg3[%c7, %c0_66, %c0_67] : memref<9x128x128xf32, #tpu.memory_space<vmem>>, vector<1x128x128xf32>
    %99 = vector.shape_cast %98 : vector<1x128x128xf32> to vector<128x128xf32>
    %cst_68 = arith.constant dense<0.000000e+00> : vector<128x128xf32>
    %100 = tpu.matmul %97, %99, %cst_68 {dimension_numbers = #tpu.dot_dimension_numbers<[1], [0], [0], [1], [0, 0, 1, 1], [], []>} : vector<128x128xf32>, vector<128x128xf32>, vector<128x128xf32> -> vector<128x128xf32>
    %c0_69 = arith.constant 0 : index
    %c0_70 = arith.constant 0 : index
    %101 = vector.load %arg7[%c0_69, %c0_70] : memref<128x128xf32, #tpu.memory_space<vmem>>, vector<128x128xf32>
    %102 = arith.addf %101, %100 : vector<128x128xf32>
    %c0_71 = arith.constant 0 : index
    %c0_72 = arith.constant 0 : index
    %103 = vector.load %arg7[%c0_71, %c0_72] : memref<128x128xf32, #tpu.memory_space<vmem>>, vector<128x128xf32>
    tpu.vector_store %arg7[%c0_71, %c0_72], %102 {strides = array<i32>} : memref<128x128xf32, #tpu.memory_space<vmem>>, vector<128x128xf32>,
    %104 = vector.extract_strided_slice %49 {offsets = [32, 0], sizes = [128, 128], strides = [1, 1]} : vector<160x128xf32> to vector<128x128xf32>
    %c8 = arith.constant 8 : index
    %c0_73 = arith.constant 0 : index
    %c0_74 = arith.constant 0 : index
    %105 = vector.load %arg3[%c8, %c0_73, %c0_74] : memref<9x128x128xf32, #tpu.memory_space<vmem>>, vector<1x128x128xf32>
    %106 = vector.shape_cast %105 : vector<1x128x128xf32> to vector<128x128xf32>
    %cst_75 = arith.constant dense<0.000000e+00> : vector<128x128xf32>
    %107 = tpu.matmul %104, %106, %cst_75 {dimension_numbers = #tpu.dot_dimension_numbers<[1], [0], [0], [1], [0, 0, 1, 1], [], []>} : vector<128x128xf32>, vector<128x128xf32>, vector<128x128xf32> -> vector<128x128xf32>
    %c0_76 = arith.constant 0 : index
    %c0_77 = arith.constant 0 : index
    %108 = vector.load %arg7[%c0_76, %c0_77] : memref<128x128xf32, #tpu.memory_space<vmem>>, vector<128x128xf32>
    %109 = arith.addf %108, %107 : vector<128x128xf32>
    %c0_78 = arith.constant 0 : index
    %c0_79 = arith.constant 0 : index
    %110 = vector.load %arg7[%c0_78, %c0_79] : memref<128x128xf32, #tpu.memory_space<vmem>>, vector<128x128xf32>
    tpu.vector_store %arg7[%c0_78, %c0_79], %109 {strides = array<i32>} : memref<128x128xf32, #tpu.memory_space<vmem>>, vector<128x128xf32>,
    %c0_80 = arith.constant 0 : index
    %c0_81 = arith.constant 0 : index
    %111 = vector.load %arg7[%c0_80, %c0_81] : memref<128x128xf32, #tpu.memory_space<vmem>>, vector<128x128xf32>
    %c0_82 = arith.constant 0 : index
    %c0_83 = arith.constant 0 : index
    %112 = vector.load %arg4[%c0_82, %c0_83] : memref<1x128xf32, #tpu.memory_space<vmem>>, vector<1x128xf32>
    %113 = vector.broadcast %112 : vector<1x128xf32> to vector<128x128xf32>
    %114 = arith.addf %111, %113 : vector<128x128xf32>
    %c0_84 = arith.constant 0 : index
    %c0_85 = arith.constant 0 : index
    %c0_86 = arith.constant 0 : index
    %115 = vector.load %arg5[%c0_84, %c0_85, %c0_86] : memref<1x128x128xf32, #tpu.memory_space<vmem>>, vector<1x128x128xf32>
    %116 = vector.shape_cast %115 : vector<1x128x128xf32> to vector<128x128xf32>
    %117 = vector.shape_cast %114 : vector<128x128xf32> to vector<1x128x128xf32>
    tpu.vector_store %arg5[%c0_84, %c0_85, %c0_86], %117 {strides = array<i32>} : memref<1x128x128xf32, #tpu.memory_space<vmem>>, vector<1x128x128xf32>,
    return
  }
  func.func @transform_0(%arg0: i32, %arg1: i32) -> (i32, i32, i32) {
    %c0_i32 = arith.constant 0 : i32
    %c0_i32_0 = arith.constant 0 : i32
    %c0_i32_1 = arith.constant 0 : i32
    return %arg0, %c0_i32, %c0_i32_0 : i32, i32, i32
  }
  func.func @transform_1(%arg0: i32, %arg1: i32) -> (i32, i32, i32) {
    %c0_i32 = arith.constant 0 : i32
    %c0_i32_0 = arith.constant 0 : i32
    %c0_i32_1 = arith.constant 0 : i32
    %c0_i32_2 = arith.constant 0 : i32
    return %c0_i32, %c0_i32_0, %c0_i32_1 : i32, i32, i32
  }
  func.func @transform_2(%arg0: i32, %arg1: i32) -> (i32, i32) {
    %c0_i32 = arith.constant 0 : i32
    %c0_i32_0 = arith.constant 0 : i32
    %c0_i32_1 = arith.constant 0 : i32
    return %c0_i32, %c0_i32_0 : i32, i32
  }
  func.func @transform_3(%arg0: i32, %arg1: i32) -> (i32, i32, i32) {
    %c0_i32 = arith.constant 0 : i32
    %c0_i32_0 = arith.constant 0 : i32
    return %arg0, %arg1, %c0_i32 : i32, i32, i32
  }
}

</mosaic_0001>

<bundles_post_ra>
// kernel: tpu_custom_call.1
= control target key start
LH: loop header
LB: loop body
LE: loop exit
PB: predicated region body
PF: predicated region fallthrough
CT: control target
= control target key end

     0   :  { %s5505_s0 = inlined_call_operand.hbm [shape: f32[2,256,128], index: 0, kind: input, shape index: {}]   ;;  %s5506_s1 = inlined_call_operand.hbm [shape: f32[9,128,128], index: 1, kind: input, shape index: {}]   ;;  %s5507_s2 = inlined_call_operand.hbm [shape: f32[1,128], index: 2, kind: input, shape index: {}]   ;;  %s5508_s3 = inlined_call_operand.hbm [shape: f32[2,256,128], index: 3, kind: output, shape index: {}]  }
   0x1   :  { %5546 = sst [smem:[#allocation36_spill]] %s5506_s1 }
   0x2   :  { %5547 = sst [smem:[#allocation37_spill]] %s5507_s2 }
   0x3   :  { %8 = vsyncpa [#allocation5], 0 }
   0x4   :  { %10 = vsyncpa [#allocation5 + $0x1], 0 }
   0x5   :  { %11 = vsyncpa [#allocation8], 0 }
   0x6   :  { %12 = vsyncpa [#allocation6], 0 }
   0x7   :  { %14 = vsyncpa [#allocation6 + $0x1], 0  ;;  %s4537_s12 = smov 0   ;;  %s4539_s13 = smov 0  }
   0x8   :  { %s4541_s14 = smov 0   ;;  %s4543_s15 = smov 0  }
   0x9   :  { %s4545_s16 = smov 0   ;;  %s4547_s17 = smov 0  }
   0xa   :  { %s4549_s18 = smov 0   ;;  %s4551_s19 = smov 0  }
   0xb   :  { %s4553_s20 = smov 0   ;;  %s4555_s21 = smov 0  }
   0xc   :  { %s4557_s22 = smov 0  }
   0xd LB: > { %5548 = sst [smem:[#allocation14_spill]] %s4465_s12  ;;  %s2860_s23 = sadd.s32 4294967295, %s4505_s22   ;;  %s4505_s22 = sphi %s4557_s22, %s20_s22   ;;  %s4501_s21 = sphi %s4555_s21, %s5659_s21   ;;  %s4497_s20 = sphi %s4553_s20, %s5650_s20   ;;  %s4493_s19 = sphi %s4551_s19, %s5658_s19   ;;  %s4489_s18 = sphi %s4549_s18, %s5649_s18   ;;  %s4485_s17 = sphi %s4547_s17, %s5657_s17   ;;  %s4481_s16 = sphi %s4545_s16, %s5656_s16   ;;  %s4477_s15 = sphi %s4543_s15, %s5655_s15   ;;  %s4473_s14 = sphi %s4541_s14, %s5654_s14   ;;  %s4469_s13 = sphi %s4539_s13, %s5653_s13   ;;  %s4465_s12 = sphi %s4537_s12, %s5652_s12  }
   0xe   : > { %5549 = sst [smem:[#allocation15_spill]] %s4497_s20  ;;  %s2861_s24 = sadd.s32 4294967294, %s4505_s22  }
   0xf   : > { %p52_p0 = scmp.ne.s32.totalorder %s4481_s16, %s4477_s15  ;;  %p4593_p1 = scmp.eq.s32.totalorder %s2860_s23, 0 }
  0x10   : > { %p119_p2 = scmp.ne.s32.totalorder %s4473_s14, %s4469_s13  ;;  %p120_p4 = scmp.eq.s32.totalorder %s2860_s23, 3 }
  0x11   : > { %s5550_s25 = scalar_select %p4593_p1, 1, 0 }
  0x12   : > { %p4602_p3 = por %p4593_p1, %p52_p0  ;;  %p125_p5 = scmp.ne.s32.totalorder %s4469_s13, %s4465_s12 }
  0x13   : > { %p126_p6 = scmp.eq.s32.totalorder %s2861_s24, 3  ;;  %p4608_p7 = por %p120_p4, %p119_p2 }
  0x14   : > { %s5551_s27 = scalar_select %p4602_p3, 1, 0 }
  0x15   : > { %s5552_s28 = scalar_select %p4608_p7, 1, 0 }
  0x16   : > { %p2862_p8 = scmp.ge.s32.totalorder %s4505_s22, 1  ;;  %p4613_p9 = por %p126_p6, %p125_p5 }
  0x17   : > { %p133_p10 = scmp.lt.s32.totalorder %s4505_s22, 5  ;;  %s4507_s4 = smov [#allocation7]  }
  0x18   : > { %s5553_s29 = scalar_select %p4613_p9, 1, 0 }
  0x19   : > { %p4618_p11 = pnand %p2862_p8, %p133_p10  ;;  %s145_s5 = sshll.u32 %s4507_s4, 4  ;;  %s146_s5 = int_to_ptr.vmem [resolvable:$true] %s145_s5 }
  0x1a   : > { %5554 = sst [smem:[#allocation16_spill]] %s5553_s29  ;;  %s4508_s7 = smov [#allocation9]  }
  0x1b   : > { %s5555_s30 = scalar_select %p4618_p11, 1, 0 }
  0x1c   : > { %p4175_p12 = pneg %p4618_p11  ;;  %s159_s8 = sshll.u32 %s4508_s7, 4  ;;  %s4630_s8 = int_to_ptr.vmem [resolvable:$true] %s159_s8 }
  0x1d   : > { %s5557_s1 = sld [smem:[#allocation36_spill]] }
  0x1e   : > { %p4626_p13 = pnand %p4175_p12, %p4593_p1 }
  0x20   : > { %p4295_p2 = pneg %p4626_p13 }
  0x23   : > { %s4293_s11 = scalar_lea.hbm %s5557_s1, 18432 }
  0x24   : > { %p4294_p0 = scmp.ne.s32.totalorder %s5557_s1, %s4293_s11  ;;  %p4300_p6 = scmp.lt.u32.totalorder %s4293_s11, %s5557_s1 }
  0x26   : > { %p4296_p4 = pnand %p4295_p2, %p4294_p0 }
  0x28   : > { %p4297_p5 = pneg %p4296_p4 }
  0x2a   : > { %p4302_p8 = pnand %p4300_p6, %p4297_p5 }
  0x2c   : > { %4305 = shalt.err (!%p4302_p8)
}
  0x2d   : > { %s4306_s7 = scalar_lea.vmem %s146_s5, 18432  ;;  %p4314_p7 = scmp.lt.s32.totalorder %s146_s5, %s146_s5 }
  0x2e   : > { %p4307_p10 = scmp.ne.s32.totalorder %s146_s5, %s4306_s7  ;;  %p4315_p1 = scmp.lt.s32.totalorder %s4306_s7, %s4306_s7 }
  0x30   : > { %p4309_p12 = pnand %p4307_p10, %p4295_p2  ;;  %p4316_p3 = por %p4315_p1, %p4314_p7 }
  0x32   : > { %p4310_p9 = pneg %p4309_p12 }
  0x34   : > { %p4317_p11 = pnand %p4316_p3, %p4310_p9 }
  0x36   : > { %4320 = shalt.err (!%p4317_p11)
}
  0x37   : > { %s5516_s9 = smov 128   ;;  %s5517_s10 = smov 8  }
  0x38   : > { %4178 = dma.hbm_to_vmem [thread:$0]  (!%p4626_p13), %s5557_s1, 18432, %s146_s5, [#allocation8], %s5516_s9, %s5516_s9, %s5517_s10  }
  0x39   : > { %s5558_s2 = sld [smem:[#allocation37_spill]] }
  0x3f   : > { %s4321_s4 = scalar_lea.hbm %s5558_s2, 16 }
  0x40   : > { %p4322_p1 = scmp.ne.s32.totalorder %s5558_s2, %s4321_s4  ;;  %p4328_p9 = scmp.lt.u32.totalorder %s4321_s4, %s5558_s2 }
  0x42   : > { %p4324_p3 = pnand %p4322_p1, %p4295_p2 }
  0x44   : > { %p4325_p7 = pneg %p4324_p3 }
  0x46   : > { %p4330_p11 = pnand %p4328_p9, %p4325_p7 }
  0x48   : > { %4333 = shalt.err (!%p4330_p11)
}
  0x49   : > { %s4334_s5 = scalar_lea.vmem %s4630_s8, 16  ;;  %s4341_s26 = scalar_lea.vmem %s4630_s8, 32 }
  0x4a   : > { %p4335_p0 = scmp.ne.s32.totalorder %s4630_s8, %s4334_s5  ;;  %p4342_p6 = scmp.lt.s32.totalorder %s4630_s8, %s4630_s8 }
  0x4b   : > { %p4343_p8 = scmp.lt.s32.totalorder %s4341_s26, %s4334_s5 }
  0x4c   : > { %p4337_p4 = pnand %p4335_p0, %p4295_p2 }
  0x4d   : > { %p4344_p10 = por %p4343_p8, %p4342_p6 }
  0x4e   : > { %p4338_p5 = pneg %p4337_p4 }
  0x50   : > { %p4345_p12 = pnand %p4344_p10, %p4338_p5 }
  0x52   : > { %4348 = shalt.err (!%p4345_p12)
}
  0x53   : > { %4181 = dma.hbm_to_vmem [thread:$0]  (!%p4626_p13), %s5558_s2, 16, %s4630_s8, [#allocation8]  }
  0x54   : > { %s29_s11 = sadd.s32 1, %s4497_s20  ;;  %s32_s15 = sadd.s32 1, %s4501_s21 }
  0x55   : > { %p30_p2 = scmp.ge.s32.totalorder %s29_s11, 2  ;;  %s39_s6 = sadd.s32 1, %s4485_s17 }
  0x56   : > { %p46_p1 = scmp.ne.s32.totalorder %s4485_s17, %s4481_s16  ;;  %p47_p3 = scmp.eq.s32.totalorder %s4505_s22, 0 }
  0x57   : > { %s5661_s11 = smov (%p30_p2, %s29_s11), 0  ;;  %s5663_s15 = smov (!%p30_p2, %s32_s15), %s4501_s21 }
  0x58   : > { %5559 = sst [smem:[#allocation17_spill]] %s5661_s11  ;;  %p4692_p7 = por %p47_p3, %p46_p1 }
  0x59   : > { %s105_s24 = ssub.s32 %s4497_s20, %s5661_s11  ;;  %p34_p13 = scmp.ge.s32.totalorder %s5663_s15, 2 }
  0x5a   : > { %p4192_p9 = scmp.lt.s32.totalorder %s4505_s22, 4  ;;  %s170_s8 = sand.u32 1, %s4485_s17  }
  0x5b   : > { %s2938_s4 = sshll.u32 %s4501_s21, 12  ;;  %s5665_s15 = smov (%p34_p13, %s5663_s15), 0 }
  0x5c   : > { %s2866_s7 = sshll.u32 %s170_s8, 8  ;;  %s36_s5 = ssub.s32 %s4501_s21, %s5665_s15 }
  0x5d   : > { %p37_p11 = scmp.eq.s32.totalorder %s36_s5, 0  ;;  %s106_s26 = sor.u32 %s105_s24, %s36_s5 }
  0x5e   : > { %p107_p0 = scmp.eq.s32.totalorder %s106_s26, 0  ;;  %s4708_s9 = scalar_lea.hbm %s5505_s0, %s2938_s4 }
  0x5f   : > { %s4711_s10 = scalar_select %p37_p11, %s4485_s17, %s39_s6  }
  0x60   : > { %s5561_s1 = sadd.s32 1, %s4473_s14  ;;  %s174_s11 = scalar_lea.vmem [#allocation4], %s2866_s7 }
  0x61   : > { %s4716_s2 = scalar_select %p107_p0, %s4473_s14, %s5561_s1  }
  0x62   : > { %s181_s20 = sshll.u32 %s174_s11, 4  ;;  %p4722_p4 = pnand %p4192_p9, %p4692_p7  ;;  %s4726_s20 = int_to_ptr.vmem [resolvable:$true] %s181_s20 }
  0x63   : > { %s4728_s4 = scalar_lea.sflag [#allocation5], %s170_s8  ;;  %s4349_s6 = scalar_lea.hbm %s4708_s9, 4096 }
  0x64   : > { %p4350_p5 = scmp.ne.s32.totalorder %s4708_s9, %s4349_s6  ;;  %p4351_p6 = pneg %p4722_p4 }
  0x65   : > { %s4354_s23 = scalar_lea.hbm %s5505_s0, 8192  ;;  %p4355_p12 = scmp.lt.u32.totalorder %s4708_s9, %s5505_s0 }
  0x66   : > { %p4352_p8 = pnand %p4351_p6, %p4350_p5  ;;  %p4356_p2 = scmp.lt.u32.totalorder %s4354_s23, %s4349_s6 }
  0x67   : > { %p4358_p3 = scmp.lt.u32.totalorder %s4349_s6, %s4708_s9 }
  0x68   : > { %p4353_p10 = pneg %p4352_p8  ;;  %p4357_p1 = por %p4356_p2, %p4355_p12 }
  0x6a   : > { %p4359_p7 = por %p4358_p3, %p4357_p1 }
  0x6c   : > { %p4360_p13 = pnand %p4359_p7, %p4353_p10 }
  0x6e   : > { %4363 = shalt.err (!%p4360_p13)
}
  0x6f   : > { %s4364_s8 = scalar_lea.vmem %s4726_s20, 4096  ;;  %s4511_s26 = smov [#allocation4]  }
  0x70   : > { %p4365_p9 = scmp.ne.s32.totalorder %s4726_s20, %s4364_s8  ;;  %s4369_s12 = sshll.u32 %s4511_s26, 4  ;;  %s4370_s12 = int_to_ptr.vmem [resolvable:$false] %s4369_s12 }
  0x71   : > { %s4371_s29 = scalar_lea.vmem %s4370_s12, 8192  ;;  %p4372_p5 = scmp.lt.s32.totalorder %s4726_s20, %s4370_s12 }
  0x72   : > { %p4367_p11 = pnand %p4365_p9, %p4351_p6  ;;  %p4373_p8 = scmp.lt.s32.totalorder %s4371_s29, %s4364_s8 }
  0x74   : > { %p4368_p0 = pneg %p4367_p11  ;;  %p4374_p12 = por %p4373_p8, %p4372_p5 }
  0x76   : > { %p4375_p2 = pnand %p4374_p12, %p4368_p0 }
  0x78   : > { %4378 = shalt.err (!%p4375_p2)
}
  0x79   : > { %s5563_s6 = smov 8   ;;  %s5564_s1 = smov 128  }
  0x7a   : > { %4185 = dma.hbm_to_vmem [thread:$0]  (!%p4722_p4), %s4708_s9, 4096, %s4726_s20, %s4728_s4, %s5564_s1, %s5564_s1, %s5563_s6  }
  0x7b   : > { %p5565_p6 = scmp.ne.s32.totalorder %s5555_s30, 0 }
  0x7d   : > { %193 = sbr.rel (%p5565_p6) target bundleno = 586 (0x24a), region = 32 }
  0x84   : > { %s195_s11 = sand.u32 1, %s4481_s16   ;;  %p5566_p10 = scmp.ne.s32.totalorder %s5551_s27, 0 }
  0x85   : > { %s4762_s23 = sshll.u32 %s195_s11, 8  ;;  %s196_s7 = scalar_lea.sflag [#allocation5], %s195_s11 }
  0x86   : > { %s199_s5 = scalar_lea.vmem [#allocation4], %s4762_s23 }
  0x87   : > { %4452 = dma.done.wait (%p5566_p10), %s196_s7, 4096  }
  0x88   : > { %4454 = vsyncadd (%p5566_p10), %s196_s7, 4294963200  ;;  %p5567_p1 = scmp.ne.s32.totalorder %s5550_s25, 0 }
  0x8a   : > { %4456 = dma.done.wait (%p5567_p1), [#allocation8], 18448  }
  0x8b   : > { %4458 = vsyncadd (%p5567_p1), [#allocation8], 4294948848  ;;  %s227_s20 = sand.u32 1, %s4469_s13   ;;  %s2874_s9 = sshll.u32 %s4489_s18, 7 }
  0x8c   : > { %s4776_s30 = sshll.u32 %s227_s20, 7  ;;  %s4783_s27 = scalar_lea.vmem %s199_s5, %s2874_s9 [#allocation4] }
  0x8d   : > { %v233_v0 = vld [vmem:[%s4783_s27] sm:$0xff]  ;;  %v234_v1 = vld [vmem:[%s4783_s27 + $0x8] sm:$0xff]  ;;  %v235_v2 = vld [vmem:[%s4783_s27 + $0x10] sm:$0xff]  ;;  %s4802_s25 = scalar_lea.vmem [#allocation10], %s4776_s30  ;;  %p2875_p4 = scmp.ne.s32.totalorder %s4489_s18, 0 }
  0x8e   : > { %249 = vst [vmem:[#allocation2 + $0x10] sm:$0xff] %v233_v0  ;;  %250 = vst [vmem:[#allocation2 + $0x18] sm:$0xff] %v234_v1  ;;  %v236_v3 = vld [vmem:[%s4783_s27 + $0x18] sm:$0xff]  ;;  %v237_v4 = vld [vmem:[%s4783_s27 + $0x20] sm:$0xff]  ;;  %v4512_v16 = vmov (!%p2875_p4), 0.0  }
  0x8f   : > { %251 = vst [vmem:[#allocation2 + $0x20] sm:$0xff] %v235_v2  ;;  %v238_v5 = vld [vmem:[%s4783_s27 + $0x28] sm:$0xff]  ;;  %252 = vst [vmem:[#allocation2 + $0x28] sm:$0xff] %v236_v3  ;;  %v239_v6 = vld [vmem:[%s4783_s27 + $0x30] sm:$0xff]  ;;  %268 = sbr.rel (%p2875_p4) target bundleno = 151 (0x97), region = 48 }
  0x90   : > { %253 = vst [vmem:[#allocation2 + $0x30] sm:$0xff] %v237_v4  ;;  %254 = vst [vmem:[#allocation2 + $0x38] sm:$0xff] %v238_v5  ;;  %v240_v7 = vld [vmem:[%s4783_s27 + $0x38] sm:$0xff]  ;;  %v241_v8 = vld [vmem:[%s4783_s27 + $0x40] sm:$0xff] }
  0x91   : > { %255 = vst [vmem:[#allocation2 + $0x40] sm:$0xff] %v239_v6  ;;  %256 = vst [vmem:[#allocation2 + $0x48] sm:$0xff] %v240_v7  ;;  %v242_v9 = vld [vmem:[%s4783_s27 + $0x48] sm:$0xff]  ;;  %v243_v10 = vld [vmem:[%s4783_s27 + $0x50] sm:$0xff] }
  0x92   : > { %257 = vst [vmem:[#allocation2 + $0x50] sm:$0xff] %v241_v8  ;;  %v244_v11 = vld [vmem:[%s4783_s27 + $0x58] sm:$0xff]  ;;  %258 = vst [vmem:[#allocation2 + $0x58] sm:$0xff] %v242_v9  ;;  %v245_v12 = vld [vmem:[%s4783_s27 + $0x60] sm:$0xff] }
  0x93   : > { %259 = vst [vmem:[#allocation2 + $0x60] sm:$0xff] %v243_v10  ;;  %260 = vst [vmem:[#allocation2 + $0x68] sm:$0xff] %v244_v11  ;;  %v246_v13 = vld [vmem:[%s4783_s27 + $0x68] sm:$0xff]  ;;  %v247_v14 = vld [vmem:[%s4783_s27 + $0x70] sm:$0xff] }
  0x94   : > { %261 = vst [vmem:[#allocation2 + $0x70] sm:$0xff] %v245_v12  ;;  %262 = vst [vmem:[#allocation2 + $0x78] sm:$0xff] %v246_v13  ;;  %v248_v15 = vld [vmem:[%s4783_s27 + $0x78] sm:$0xff] }
  0x95   : > { %263 = vst [vmem:[#allocation2 + $0x80] sm:$0xff] %v247_v14  ;;  %264 = vst [vmem:[#allocation2 + $0x88] sm:$0xff] %v248_v15 }
  0x96   : > { %269 = vst [vmem:[#allocation2] sm:$0xff] %v4512_v16  ;;  %270 = vst [vmem:[#allocation2 + $0x8] sm:$0xff] %v4512_v16 }
  0x97 PF: > { %p2876_p3 = scmp.le.s32.totalorder %s4489_s18, 0 }
  0x98   : > { %s2877_s24 = sadd.s32 (!%p2876_p3), 4294967280, %s2874_s9 }
  0x99   : > { %274 = sbr.rel (%p2876_p3) target bundleno = 160 (0xa0), region = 52  ;;  %s276_s4 = scalar_lea.vmem (!%p2876_p3), %s199_s5, %s2877_s24 [#allocation4] }
  0x9a   : > { %v277_v17 = vld [vmem:[%s276_s4] sm:$0xff] (!%p2876_p3)  ;;  %v278_v18 = vld [vmem:[%s276_s4 + $0x8] sm:$0xff] (!%p2876_p3) }
  0x9b   : > { %279 = vst [vmem:[#allocation2] sm:$0xff] (!%p2876_p3), %v277_v17  ;;  %280 = vst [vmem:[#allocation2 + $0x8] sm:$0xff] (!%p2876_p3), %v278_v18 }
  0xa0 PF: > { %p2878_p7 = scmp.ne.s32.totalorder %s4489_s18, 1 }
  0xa1   : > { %v4513_v19 = vmov (!%p2878_p7), 0.0  }
  0xa2   : > { %284 = sbr.rel (%p2878_p7) target bundleno = 169 (0xa9), region = 56  ;;  %285 = vst [vmem:[#allocation2 + $0x90] sm:$0xff] (!%p2878_p7), %v4513_v19  ;;  %286 = vst [vmem:[#allocation2 + $0x98] sm:$0xff] (!%p2878_p7), %v4513_v19 }
  0xa9 PF: > { %p2879_p13 = scmp.ge.s32.totalorder %s4489_s18, 1 }
  0xaa   : > { %v2881_v20 = vld [vmem:[%s4783_s27 + $0x80] sm:$0xff] (!%p2879_p13)  ;;  %v2882_v21 = vld [vmem:[%s4783_s27 + $0x88] sm:$0xff] (!%p2879_p13) }
  0xab   : > { %290 = sbr.rel (%p2879_p13) target bundleno = 178 (0xb2), region = 60  ;;  %295 = vst [vmem:[#allocation2 + $0x90] sm:$0xff] (!%p2879_p13), %v2881_v20  ;;  %296 = vst [vmem:[#allocation2 + $0x98] sm:$0xff] (!%p2879_p13), %v2882_v21 }
  0xb2 PF: > { %v820_v22 = vld [vmem:[#allocation7] sm:$0xff]  ;;  %v821_v23 = vld [vmem:[#allocation7 + $0x8] sm:$0xff]  ;;  %v317_v25 = vlaneseq  ;;  %v822_v28 = vld [vmem:[#allocation7 + $0x10] sm:$0xff]  ;;  %s2933_s8 = sshll.u32 %s4489_s18, 4  ;;  %s2934_s26 = sshll.u32 %s4493_s19, 5 }
  0xb3   : > { %v1628_v24 = vld [vmem:[#allocation7 + $0x200] sm:$0xff]  ;;  %v3731_v26 = vpack.c.bf16 %v821_v23, %v820_v22  ;;  %v1629_v27 = vld [vmem:[#allocation7 + $0x208] sm:$0xff]  ;;  %v823_v29 = vld [vmem:[#allocation7 + $0x18] sm:$0xff]  ;;  %s2745_s18 = sadd.s32 %s2934_s26, %s2933_s8  ;;  %s2748_s12 = sshll.u32 %s4802_s25, 4  ;;  %s5435_s12 = int_to_ptr.vmem [resolvable:$true] %s2748_s12 }
  0xb4   : > { %v3859_v30 = vpack.c.bf16 %v1629_v27, %v1628_v24  ;;  %v3735_v31 = vpack.c.bf16 %v823_v29, %v822_v28  ;;  %v1630_v32 = vld [vmem:[#allocation7 + $0x210] sm:$0xff]  ;;  %v1631_v33 = vld [vmem:[#allocation7 + $0x218] sm:$0xff]  ;;  %v824_v34 = vld [vmem:[#allocation7 + $0x20] sm:$0xff]  ;;  %v4814_v39 = vshrl.u32 %v317_v25, 7  ;;  %s2935_s19 = sshll.u32 %s2745_s18, 7  ;;  %s5444_s11 = scalar_lea.sflag [#allocation6], %s227_s20 }
  0xb5   : > { %3732 = vmatprep.subr.bf16.mxu1 %v3731_v26  ;;  %v3863_v35 = vpack.c.bf16 %v1631_v33, %v1630_v32  ;;  %v825_v36 = vld [vmem:[#allocation7 + $0x28] sm:$0xff]  ;;  %v1632_v37 = vld [vmem:[#allocation7 + $0x220] sm:$0xff]  ;;  %v826_v42 = vld [vmem:[#allocation7 + $0x30] sm:$0xff]  ;;  %s5433_s1 = scalar_lea.hbm %s5508_s3, %s2935_s19  ;;  %s4379_s23 = scalar_lea.vmem %s5435_s12, 2048 }
  0xb6   : > { %v1633_v38 = vld [vmem:[#allocation7 + $0x228] sm:$0xff]  ;;  %3860 = vmatprep.subr.bf16.mxu0 %v3859_v30  ;;  %3734 = vmatpush3.bf16.msra.mxu1 %v3731_v26  ;;  %v3739_v40 = vpack.c.bf16 %v825_v36, %v824_v34  ;;  %v827_v43 = vld [vmem:[#allocation7 + $0x38] sm:$0xff]  ;;  %v1634_v44 = vld [vmem:[#allocation7 + $0x230] sm:$0xff]  ;;  %v342_v46 = vand.u32 15, %v4814_v39  ;;  %vm5543_vm0 = vcmp.lt.s32.totalorder %v4814_v39, 1  ;;  %v320_v18 = vadd.s32 16, %v4814_v39  ;;  %p4380_p9 = scmp.ne.s32.totalorder %s5435_s12, %s4379_s23 }
  0xb7   : > { %3862 = vmatpush3.bf16.msra.mxu0 %v3859_v30  ;;  %3736 = vmatprep.subr.bf16.mxu1 %v3735_v31  ;;  %v3867_v41 = vpack.c.bf16 %v1633_v38, %v1632_v37  ;;  %v1635_v45 = vld [vmem:[#allocation7 + $0x238] sm:$0xff]  ;;  %v3743_v47 = vpack.c.bf16 %v827_v43, %v826_v42  ;;  %v828_v48 = vld [vmem:[#allocation7 + $0x40] sm:$0xff]  ;;  %v829_v50 = vld [vmem:[#allocation7 + $0x48] sm:$0xff]  ;;  %v322_v24 = vadd.s32 32, %v4814_v39  ;;  %v324_v37 = vadd.s32 48, %v4814_v39  ;;  %p5645_p11 = scmp.ne.s32.totalorder %s5552_s28, 0 }
  0xb8   : > { %3864 = vmatprep.subr.bf16.mxu0 %v3863_v35  ;;  %v3871_v49 = vpack.c.bf16 %v1635_v45, %v1634_v44  ;;  %v1636_v51 = vld [vmem:[#allocation7 + $0x240] sm:$0xff]  ;;  %v1637_v53 = vld [vmem:[#allocation7 + $0x248] sm:$0xff]  ;;  %v4819_v54 = vld [vmem:[#allocation2 + $0x98] sm:$0xff]  ;;  %vm619_vm1 = vcmp.ge.s32.totalorder %v342_v46, 1  ;;  %v3747_v58 = vpack.c.bf16 %v829_v50, %v828_v48  ;;  %v356_v27 = vand.u32 15, %v320_v18  ;;  %s4514_s7 = smov [#allocation10]  }
  0xb9   : > { %v4817_v52 = vld [vmem:[#allocation2] sm:$0xff]  ;;  %v4823_v56 = vld [vmem:[#allocation2 + $0x10] sm:$0xff]  ;;  %v597_v57 = vrot.slane %v4819_v54, 7  ;;  %v3875_v59 = vpack.c.bf16 %v1637_v53, %v1636_v51  ;;  %v831_v61 = vld [vmem:[#allocation7 + $0x58] sm:$0xff]  ;;  %v370_v36 = vand.u32 15, %v322_v24  ;;  %v384_v53 = vand.u32 15, %v324_v37  ;;  %p4381_p0 = pnand %p4380_p9, %p5645_p11 }
  0xba   : > { %3738 = vmatpush3.bf16.msra.mxu1 %v3735_v31  ;;  %v578_v55 = vrot.slane %v4817_v52, 7  ;;  %3483 = vmatprep.mubr.f32.mxu0 %v4823_v56  ;;  %v830_v60 = vld [vmem:[#allocation7 + $0x50] sm:$0xff]  ;;  %v1639_v0 = vld [vmem:[#allocation7 + $0x258] sm:$0xff]  ;;  %v832_v3 = vld [vmem:[#allocation7 + $0x60] sm:$0xff]  ;;  %v580_v25 = vrot.slane %v4823_v56, 7  ;;  %vm4855_vm2 = vcmp.ge.s32.totalorder %v356_v27, 1 }
  0xbb   : > { %3866 = vmatpush3.bf16.msra.mxu0 %v3863_v35  ;;  %3740 = vmatprep.subr.bf16.mxu1 %v3739_v40  ;;  %v1638_v63 = vld [vmem:[#allocation7 + $0x250] sm:$0xff]  ;;  %v3751_v1 = vpack.c.bf16 %v831_v61, %v830_v60  ;;  %v833_v4 = vld [vmem:[#allocation7 + $0x68] sm:$0xff]  ;;  %v1640_v5 = vld [vmem:[#allocation7 + $0x260] sm:$0xff]  ;;  %vm4879_vm3 = vcmp.ge.s32.totalorder %v370_v36, 1  ;;  %vm4904_vm4 = vcmp.ge.s32.totalorder %v384_v53, 1  ;;  %vm719_vm8 = vcmp.lt.s32.totalorder %v4814_v39, 7  ;;  %p4382_p5 = pneg %p4381_p0 }
  0xbc   : > { %3868 = vmatprep.subr.bf16.mxu0 %v3867_v41  ;;  %v618_v62 = vsel %vm5543_vm0, %v597_v57, %v578_v55  ;;  %v3879_v2 = vpack.c.bf16 %v1639_v0, %v1638_v63  ;;  %v1641_v6 = vld [vmem:[#allocation7 + $0x268] sm:$0xff]  ;;  %v3755_v7 = vpack.c.bf16 %v833_v4, %v832_v3  ;;  %v834_v9 = vld [vmem:[#allocation7 + $0x70] sm:$0xff]  ;;  %v835_v10 = vld [vmem:[#allocation7 + $0x78] sm:$0xff]  ;;  %s4383_s5 = sshll.u32 %s4514_s7, 4  ;;  %s4384_s5 = int_to_ptr.vmem [resolvable:$false] %s4383_s5 }
  0xbd   : > { %3259 = vmatprep.mubr.msk.f32.mxu1 %vm619_vm1, %v618_v62  ;;  %v3883_v8 = vpack.c.bf16 %v1641_v6, %v1640_v5  ;;  %v1642_v11 = vld [vmem:[#allocation7 + $0x270] sm:$0xff]  ;;  %v1643_v12 = vld [vmem:[#allocation7 + $0x278] sm:$0xff]  ;;  %v3759_v13 = vpack.c.bf16 %v835_v10, %v834_v9  ;;  %v4833_v14 = vld [vmem:[#allocation2 + $0x8] sm:$0xff]  ;;  %s4385_s30 = scalar_lea.vmem %s4384_s5, 4096  ;;  %p4386_p8 = scmp.lt.s32.totalorder %s5435_s12, %s4384_s5 }
  0xbe   : > { %3742 = vmatpush3.bf16.msra.mxu1 %v3739_v40  ;;  %v3887_v15 = vpack.c.bf16 %v1643_v12, %v1642_v11  ;;  %v998_v16 = vld [vmem:[#allocation7 + $0x80] sm:$0xff]  ;;  %v999_v17 = vld [vmem:[#allocation7 + $0x88] sm:$0xff]  ;;  %v579_v21 = vrot.slane %v4833_v14, 7  ;;  %v4837_v23 = vld [vmem:[#allocation2 + $0x18] sm:$0xff]  ;;  %v5571_v40 = vmov 0  ;;  %p4387_p12 = scmp.lt.s32.totalorder %s4385_s30, %s4379_s23 }
  0xbf   : > { %3870 = vmatpush3.bf16.msra.mxu0 %v3867_v41  ;;  %3744 = vmatprep.subr.bf16.mxu1 %v3743_v47  ;;  %v1838_v19 = vld [vmem:[#allocation7 + $0x280] sm:$0xff]  ;;  %v1839_v20 = vld [vmem:[#allocation7 + $0x288] sm:$0xff]  ;;  %v3763_v22 = vpack.c.bf16 %v999_v17, %v998_v16  ;;  %v1000_v29 = vld [vmem:[#allocation7 + $0x90] sm:$0xff]  ;;  %v581_v32 = vrot.slane %v4837_v23, 7  ;;  %v5572_v40 = vsel %vm4855_vm2, 4294967295, %v5571_v40 }
  0xc0   : > { %3872 = vmatprep.subr.bf16.mxu0 %v3871_v49  ;;  %v3891_v26 = vpack.c.bf16 %v1839_v20, %v1838_v19  ;;  %v4841_v28 = vld [vmem:[#allocation2 + $0x20] sm:$0xff]  ;;  %v1001_v30 = vld [vmem:[#allocation7 + $0x98] sm:$0xff]  ;;  %v617_v31 = vsel %vm5543_vm0, %v578_v55, %v579_v21  ;;  %v1840_v33 = vld [vmem:[#allocation7 + $0x290] sm:$0xff]  ;;  %v4853_v38 = vsel %vm5543_vm0, %v579_v21, %v580_v25  ;;  %5573 = vst [vmem:[#allocation21_spill] sm:$0xff] %v5572_v40  ;;  %v326_v55 = vadd.s32 64, %v4814_v39  ;;  %p4388_p2 = por %p4387_p12, %p4386_p8 }
  0xc1   : > { %5568 = vst [vmem:[#allocation18_spill] sm:$0xff] %v4841_v28  ;;  %v1841_v34 = vld [vmem:[#allocation7 + $0x298] sm:$0xff]  ;;  %v4848_v35 = vld [vmem:[#allocation2 + $0x28] sm:$0xff]  ;;  %5570 = vst [vmem:[#allocation20_spill] sm:$0xff] %v4853_v38  ;;  %v3767_v41 = vpack.c.bf16 %v1001_v30, %v1000_v29  ;;  %v582_v42 = vrot.slane %v4841_v28, 7 }
  0xc2   : > { %3746 = vmatpush3.bf16.msra.mxu1 %v3743_v47  ;;  %5569 = vst [vmem:[#allocation19_spill] sm:$0xff] %v4848_v35  ;;  %v3895_v43 = vpack.c.bf16 %v1841_v34, %v1840_v33  ;;  %v4860_v44 = vld [vmem:[#allocation2 + $0x30] sm:$0xff]  ;;  %v1002_v45 = vld [vmem:[#allocation7 + $0xa0] sm:$0xff]  ;;  %v1003_v46 = vld [vmem:[#allocation7 + $0xa8] sm:$0xff]  ;;  %v4865_v47 = vsel %vm5543_vm0, %v580_v25, %v581_v32  ;;  %v583_v48 = vrot.slane %v4848_v35, 7  ;;  %v330_v25 = vadd.s32 96, %v4814_v39  ;;  %p4389_p6 = pnand %p4388_p2, %p4382_p5 }
  0xc3   : > { %3874 = vmatpush3.bf16.msra.mxu0 %v3871_v49  ;;  %3748 = vmatprep.subr.bf16.mxu1 %v3747_v58  ;;  %5574 = vst [vmem:[#allocation22_spill] sm:$0xff] %v4860_v44  ;;  %5575 = vst [vmem:[#allocation23_spill] sm:$0xff] %v4865_v47  ;;  %v1842_v49 = vld [vmem:[#allocation7 + $0x2a0] sm:$0xff]  ;;  %v1843_v50 = vld [vmem:[#allocation7 + $0x2a8] sm:$0xff]  ;;  %v3771_v60 = vpack.c.bf16 %v1003_v46, %v1002_v45  ;;  %v584_v61 = vrot.slane %v4860_v44, 7 }
  0xc4   : > { %3876 = vmatprep.subr.bf16.mxu0 %v3875_v59  ;;  %v4871_v51 = vld [vmem:[#allocation2 + $0x38] sm:$0xff]  ;;  %v3899_v62 = vpack.c.bf16 %v1843_v50, %v1842_v49  ;;  %v4885_v63 = vld [vmem:[#allocation2 + $0x40] sm:$0xff]  ;;  %v1004_v0 = vld [vmem:[#allocation7 + $0xb0] sm:$0xff]  ;;  %v426_v46 = vand.u32 15, %v330_v25 }
  0xc5   : > { %5576 = vst [vmem:[#allocation24_spill] sm:$0xff] %v4871_v51  ;;  %5579 = vst [vmem:[#allocation25_spill] sm:$0xff] %v4885_v63  ;;  %v585_v3 = vrot.slane %v4871_v51, 7  ;;  %v1844_v4 = vld [vmem:[#allocation7 + $0x2b0] sm:$0xff]  ;;  %v1845_v5 = vld [vmem:[#allocation7 + $0x2b8] sm:$0xff]  ;;  %v4902_v9 = vsel %vm5543_vm0, %v583_v48, %v584_v61  ;;  %v586_v12 = vrot.slane %v4885_v63, 7 }
  0xc6   : > { %3750 = vmatpush3.bf16.msra.mxu1 %v3747_v58  ;;  %v4877_v58 = vsel %vm5543_vm0, %v581_v32, %v582_v42  ;;  %v4896_v6 = vld [vmem:[#allocation2 + $0x48] sm:$0xff]  ;;  %v1006_v16 = vld [vmem:[#allocation7 + $0xc0] sm:$0xff]  ;;  %v1008_v33 = vld [vmem:[#allocation7 + $0xd0] sm:$0xff]  ;;  %vm4983_vm7 = vcmp.ge.s32.totalorder %v426_v46, 1 }
  0xc7   : > { %3878 = vmatpush3.bf16.msra.mxu0 %v3875_v59  ;;  %3752 = vmatprep.subr.bf16.mxu1 %v3751_v1  ;;  %5580 = vst [vmem:[#allocation26_spill] sm:$0xff] %v4896_v6  ;;  %v1007_v17 = vld [vmem:[#allocation7 + $0xc8] sm:$0xff]  ;;  %v4915_v18 = vsel %vm5543_vm0, %v584_v61, %v585_v3  ;;  %v587_v19 = vrot.slane %v4896_v6, 7  ;;  %v1846_v20 = vld [vmem:[#allocation7 + $0x2c0] sm:$0xff]  ;;  %v1009_v34 = vld [vmem:[#allocation7 + $0xd8] sm:$0xff] }
  0xc8   : > { %3880 = vmatprep.subr.bf16.mxu0 %v3879_v2  ;;  %v1847_v21 = vld [vmem:[#allocation7 + $0x2c8] sm:$0xff]  ;;  %v3779_v29 = vpack.c.bf16 %v1007_v17, %v1006_v16  ;;  %v4935_v32 = vld [vmem:[#allocation2 + $0x60] sm:$0xff]  ;;  %v4953_v49 = vld [vmem:[#allocation2 + $0x90] sm:$0xff]  ;;  %v3783_v53 = vpack.c.bf16 %v1009_v34, %v1008_v33 }
  0xc9   : > { %5587 = vst [vmem:[#allocation29_spill] sm:$0xff] %v4935_v32  ;;  %v4940_v36 = vsel %vm5543_vm0, %v586_v12, %v587_v19  ;;  %v4950_v45 = vld [vmem:[#allocation2 + $0x68] sm:$0xff]  ;;  %v1013_v25 = vld [vmem:[#allocation7 + $0xf8] sm:$0xff]  ;;  %v1852_v33 = vld [vmem:[#allocation7 + $0x2f0] sm:$0xff] }
  0xca   : > { %3754 = vmatpush3.bf16.msra.mxu1 %v3751_v1  ;;  %v1005_v1 = vld [vmem:[#allocation7 + $0xb8] sm:$0xff]  ;;  %v2476_v59 = vld [vmem:[#allocation7 + $0x440] sm:$0xff]  ;;  %v2478_v10 = vld [vmem:[#allocation7 + $0x450] sm:$0xff] }
  0xcb   : > { %3882 = vmatpush3.bf16.msra.mxu0 %v3879_v2  ;;  %3756 = vmatprep.subr.bf16.mxu1 %v3755_v7  ;;  %v4890_v2 = vsel %vm5543_vm0, %v582_v42, %v583_v48  ;;  %v3775_v11 = vpack.c.bf16 %v1005_v1, %v1004_v0  ;;  %v1849_v42 = vld [vmem:[#allocation7 + $0x2d8] sm:$0xff]  ;;  %v332_v48 = vadd.s32 112, %v4814_v39  ;;  %v1010_v0 = vld [vmem:[#allocation7 + $0xe0] sm:$0xff]  ;;  %v1011_v1 = vld [vmem:[#allocation7 + $0xe8] sm:$0xff] }
  0xcc   : > { %3884 = vmatprep.subr.bf16.mxu0 %v3883_v8  ;;  %v3787_v17 = vpack.c.bf16 %v1011_v1, %v1010_v0  ;;  %v1853_v34 = vld [vmem:[#allocation7 + $0x2f8] sm:$0xff]  ;;  %v702_v0 = vrot.slane %v4837_v23, 1  ;;  %v1208_v1 = vld [vmem:[#allocation7 + $0x100] sm:$0xff] }
  0xcd   : > { %v440_v16 = vand.u32 15, %v332_v48  ;;  %v1215_v40 = vld [vmem:[#allocation7 + $0x138] sm:$0xff]  ;;  %v2480_v27 = vld [vmem:[#allocation7 + $0x460] sm:$0xff] }
  0xce   : > { %3758 = vmatpush3.bf16.msra.mxu1 %v3755_v7  ;;  %v398_v7 = vand.u32 15, %v326_v55  ;;  %v590_v55 = vrot.slane %v4935_v32, 7 }
  0xcf   : > { %3886 = vmatpush3.bf16.msra.mxu0 %v3883_v8  ;;  %3760 = vmatprep.subr.bf16.mxu1 %v3759_v13  ;;  %v328_v8 = vadd.s32 80, %v4814_v39  ;;  %vm5026_vm9 = vcmp.ge.s32.totalorder %v440_v16, 1  ;;  %v2049_v16 = vld [vmem:[#allocation7 + $0x308] sm:$0xff] }
  0xd0   : > { %3888 = vmatprep.subr.bf16.mxu0 %v3887_v15  ;;  %vm4929_vm5 = vcmp.ge.s32.totalorder %v398_v7, 1  ;;  %v1850_v7 = vld [vmem:[#allocation7 + $0x2e0] sm:$0xff] }
  0xd1   : > { %v412_v24 = vand.u32 15, %v328_v8  ;;  %v1851_v8 = vld [vmem:[#allocation7 + $0x2e8] sm:$0xff] }
  0xd2   : > { %3762 = vmatpush3.bf16.msra.mxu1 %v3759_v13  ;;  %v3903_v13 = vpack.c.bf16 %v1845_v5, %v1844_v4  ;;  %v591_v5 = vrot.slane %v4950_v45, 7 }
  0xd3   : > { %3890 = vmatpush3.bf16.msra.mxu0 %v3887_v15  ;;  %3764 = vmatprep.subr.bf16.mxu1 %v3763_v22  ;;  %v4910_v15 = vld [vmem:[#allocation2 + $0x50] sm:$0xff]  ;;  %vm4946_vm6 = vcmp.ge.s32.totalorder %v412_v24, 1 }
  0xd4   : > { %3892 = vmatprep.subr.bf16.mxu0 %v3891_v26  ;;  %5583 = vst [vmem:[#allocation27_spill] sm:$0xff] %v4910_v15  ;;  %v588_v30 = vrot.slane %v4910_v15, 7  ;;  %v1012_v24 = vld [vmem:[#allocation7 + $0xf0] sm:$0xff] }
  0xd5   : > { %3260 = vmatmul.mubr.f32.vlgmr.msra.gmra.mrb[0].mxu1 %v617_v31  ;;  %v3907_v31 = vpack.c.bf16 %v1847_v21, %v1846_v20  ;;  %v5523_v20 = vrot.slane %v4817_v52, 1  ;;  %v3915_v21 = vpack.c.bf16 %v1851_v8, %v1850_v7  ;;  %v3791_v48 = vpack.c.bf16 %v1013_v25, %v1012_v24  ;;  %v2048_v8 = vld [vmem:[#allocation7 + $0x300] sm:$0xff]  ;;  %v5046_v24 = vld [vmem:[#allocation2 + $0x88] sm:$0xff] }
  0xd6   : > { %3484 = vmatmul.mubr.f32.vlgmr.msra.gmra.mrb[0].mxu0 %v4837_v23  ;;  %3766 = vmatpush3.bf16.msra.mxu1 %v3763_v22  ;;  %v4921_v22 = vld [vmem:[#allocation2 + $0x58] sm:$0xff]  ;;  %v4958_v50 = vsel %vm5543_vm0, %v587_v19, %v588_v30 }
  0xd7   : > { %3894 = vmatpush3.bf16.msra.mxu0 %v3891_v26  ;;  %3262 = vmatprep.mubr.msk.f32.mxu1 %vm4855_vm2, %v4853_v38  ;;  %5584 = vst [vmem:[#allocation28_spill] sm:$0xff] %v4921_v22  ;;  %v4927_v26 = vsel %vm5543_vm0, %v585_v3, %v586_v12  ;;  %v589_v37 = vrot.slane %v4921_v22, 7  ;;  %v718_v3 = vrot.slane %v4819_v54, 1  ;;  %v5524_v54 = vrot.slane %v4953_v49, 1 }
  0xd8   : > { %3486 = vmatprep.mubr.f32.mxu0 %v4841_v28  ;;  %3768 = vmatprep.subr.bf16.mxu1 %v3767_v41  ;;  %v711_v38 = vrot.slane %v4935_v32, 1 }
  0xd9   : > { %3263 = vmatmul.mubr.f32.gmra.mrb[2].mxu1 %v4865_v47  ;;  %3896 = vmatprep.subr.bf16.mxu0 %v3895_v43  ;;  %v4969_v4 = vsel %vm5543_vm0, %v588_v30, %v589_v37  ;;  %v5008_v30 = vsel %vm5543_vm0, %v590_v55, %v591_v5  ;;  %v1214_v47 = vld [vmem:[#allocation7 + $0x130] sm:$0xff] }
  0xda   : > { %3487 = vmatmul.mubr.f32.gmra.mrb[2].mxu0 %v4848_v35  ;;  %3770 = vmatpush3.bf16.msra.mxu1 %v3767_v41  ;;  %v1848_v41 = vld [vmem:[#allocation7 + $0x2d0] sm:$0xff] }
  0xdb   : > { %3898 = vmatpush3.bf16.msra.mxu0 %v3895_v43  ;;  %3265 = vmatprep.mubr.msk.f32.mxu1 %vm4879_vm3, %v4877_v58  ;;  %v3911_v61 = vpack.c.bf16 %v1849_v42, %v1848_v41  ;;  %v321_v41 = vadd.s32 24, %v4814_v39 }
  0xdc   : > { %3489 = vmatprep.mubr.f32.mxu0 %v4860_v44  ;;  %3772 = vmatprep.subr.bf16.mxu1 %v3771_v60 }
  0xdd   : > { %3266 = vmatmul.mubr.f32.gmra.mrb[4].mxu1 %v4890_v2  ;;  %3900 = vmatprep.subr.bf16.mxu0 %v3899_v62  ;;  %v363_v25 = vand.u32 15, %v321_v41  ;;  %v1211_v41 = vld [vmem:[#allocation7 + $0x118] sm:$0xff] }
  0xde   : > { %3490 = vmatmul.mubr.f32.gmra.mrb[4].mxu0 %v4871_v51  ;;  %3774 = vmatpush3.bf16.msra.mxu1 %v3771_v60  ;;  %v5520_v60 = vrot.slane %v4953_v49, 7 }
  0xdf   : > { %3902 = vmatpush3.bf16.msra.mxu0 %v3899_v62  ;;  %3268 = vmatprep.mubr.msk.f32.mxu1 %vm4904_vm4, %v4902_v9  ;;  %v4963_v62 = vld [vmem:[#allocation2 + $0x70] sm:$0xff]  ;;  %vm5064_vm10 = vcmp.lt.s32.totalorder %v363_v25, 15  ;;  %v706_v25 = vrot.slane %v4871_v51, 1 }
  0xe0   : > { %3492 = vmatprep.mubr.f32.mxu0 %v4885_v63  ;;  %3776 = vmatprep.subr.bf16.mxu1 %v3775_v11  ;;  %v592_v19 = vrot.slane %v4963_v62, 7 }
  0xe1   : > { %3269 = vmatmul.mubr.f32.gmra.mrb[6].mxu1 %v4915_v18  ;;  %3904 = vmatprep.subr.bf16.mxu0 %v3903_v13 }
  0xe2   : > { %3493 = vmatmul.mubr.f32.gmra.mrb[6].mxu0 %v4896_v6  ;;  %3778 = vmatpush3.bf16.msra.mxu1 %v3775_v11  ;;  %v4978_v11 = vsel %vm5543_vm0, %v5520_v60, %v597_v57  ;;  %v4994_v57 = vsel %vm5543_vm0, %v589_v37, %v590_v55  ;;  %v5015_v37 = vsel %vm719_vm8, %v718_v3, %v5523_v20  ;;  %v1210_v60 = vld [vmem:[#allocation7 + $0x110] sm:$0xff]  ;;  %v325_v20 = vadd.s32 56, %v4814_v39 }
  0xe3   : > { %3906 = vmatpush3.bf16.msra.mxu0 %v3903_v13  ;;  %3271 = vmatprep.mubr.msk.f32.mxu1 %vm4929_vm5, %v4927_v26  ;;  %5590 = vst [vmem:[#allocation30_spill] sm:$0xff] %v4978_v11  ;;  %v4987_v13 = vld [vmem:[#allocation2 + $0x78] sm:$0xff]  ;;  %5594 = vst [vmem:[#allocation32_spill] sm:$0xff] %v5015_v37  ;;  %v5024_v42 = vsel %vm5543_vm0, %v591_v5, %v592_v19  ;;  %v3919_v55 = vpack.c.bf16 %v1853_v34, %v1852_v33  ;;  %v703_v5 = vrot.slane %v4841_v28, 1 }
  0xe4   : > { %3495 = vmatprep.mubr.f32.mxu0 %v4910_v15  ;;  %3780 = vmatprep.subr.bf16.mxu1 %v3779_v29  ;;  %v323_v33 = vadd.s32 40, %v4814_v39  ;;  %v704_v34 = vrot.slane %v4848_v35, 1  ;;  %v707_v37 = vrot.slane %v4885_v63, 1  ;;  %v1219_v11 = vld [vmem:[#allocation7 + $0x158] sm:$0xff] }
  0xe5   : > { %3272 = vmatmul.mubr.f32.gmra.mrb[8].mxu1 %v4940_v36  ;;  %3908 = vmatprep.subr.bf16.mxu0 %v3907_v31 }
  0xe6   : > { %3496 = vmatmul.mubr.f32.gmra.mrb[8].mxu0 %v4921_v22  ;;  %3782 = vmatpush3.bf16.msra.mxu1 %v3779_v29  ;;  %v5003_v29 = vsel %vm719_vm8, %v5524_v54, %v718_v3  ;;  %v1209_v3 = vld [vmem:[#allocation7 + $0x108] sm:$0xff]  ;;  %v1212_v54 = vld [vmem:[#allocation7 + $0x120] sm:$0xff] }
  0xe7   : > { %3910 = vmatpush3.bf16.msra.mxu0 %v3907_v31  ;;  %3274 = vmatprep.mubr.msk.f32.mxu1 %vm4946_vm6, %v4958_v50  ;;  %5593 = vst [vmem:[#allocation31_spill] sm:$0xff] %v5003_v29  ;;  %v5521_v31 = vrot.slane %v4987_v13, 7  ;;  %v327_v29 = vadd.s32 72, %v4814_v39 }
  0xe8   : > { %3498 = vmatprep.mubr.f32.mxu0 %v4935_v32  ;;  %3784 = vmatprep.subr.bf16.mxu1 %v3783_v53 }
  0xe9   : > { %3275 = vmatmul.mubr.f32.gmra.mrb[10].mxu1 %v4969_v4  ;;  %3912 = vmatprep.subr.bf16.mxu0 %v3911_v61  ;;  %v5041_v7 = vsel %vm5543_vm0, %v592_v19, %v5521_v31  ;;  %v2051_v31 = vld [vmem:[#allocation7 + $0x318] sm:$0xff] }
  0xea   : > { %3499 = vmatmul.mubr.f32.gmra.mrb[10].mxu0 %v4950_v45  ;;  %3786 = vmatpush3.bf16.msra.mxu1 %v3783_v53  ;;  %v5031_v53 = vld [vmem:[#allocation2 + $0x80] sm:$0xff]  ;;  %5597 = vst [vmem:[#allocation33_spill] sm:$0xff] %v5041_v7 }
  0xeb   : > { %3914 = vmatpush3.bf16.msra.mxu0 %v3911_v61  ;;  %3277 = vmatprep.mubr.msk.f32.mxu1 %vm4983_vm7, %v4994_v57  ;;  %v5522_v61 = vrot.slane %v4823_v56, 1 }
  0xec   : > { %3501 = vmatprep.mubr.f32.mxu0 %v4963_v62  ;;  %3788 = vmatprep.subr.bf16.mxu1 %v3787_v17 }
  0xed   : > { %3278 = vmatmul.mubr.f32.gmra.mrb[12].mxu1 %v5008_v30  ;;  %3916 = vmatprep.subr.bf16.mxu0 %v3915_v21  ;;  %v5055_v19 = vsel %vm719_vm8, %v5522_v61, %v702_v0 }
  0xee   : > { %3502 = vmatmul.mubr.f32.gmra.mrb[12].mxu0 %v4987_v13  ;;  %3790 = vmatpush3.bf16.msra.mxu1 %v3787_v17  ;;  %v3795_v17 = vpack.c.bf16 %v1209_v3, %v1208_v1  ;;  %v5061_v1 = vsel %vm719_vm8, %v702_v0, %v703_v5  ;;  %v2050_v3 = vld [vmem:[#allocation7 + $0x310] sm:$0xff] }
  0xef   : > { %3918 = vmatpush3.bf16.msra.mxu0 %v3915_v21  ;;  %3280 = vmatprep.mubr.msk.f32.mxu1 %vm5026_vm9, %v5024_v42  ;;  %v3923_v21 = vpack.c.bf16 %v2049_v16, %v2048_v8  ;;  %v377_v8 = vand.u32 15, %v323_v33  ;;  %v705_v16 = vrot.slane %v4860_v44, 1  ;;  %v3927_v0 = vpack.c.bf16 %v2051_v31, %v2050_v3  ;;  %v1213_v33 = vld [vmem:[#allocation7 + $0x128] sm:$0xff] }
  0xf0   : > { %3504 = vmatprep.mubr.f32.mxu0 %v5031_v53  ;;  %3792 = vmatprep.subr.bf16.mxu1 %v3791_v48  ;;  %v391_v3 = vand.u32 15, %v325_v20  ;;  %v2055_v20 = vld [vmem:[#allocation7 + $0x338] sm:$0xff] }
  0xf1   : > { %3281 = vmatmul.mubr.f32.gmra.mrb[14].mxu1 %v5041_v7  ;;  %3920 = vmatprep.subr.bf16.mxu0 %v3919_v55  ;;  %vm5086_vm11 = vcmp.lt.s32.totalorder %v377_v8, 15  ;;  %v708_v8 = vrot.slane %v4896_v6, 1  ;;  %v715_v7 = vrot.slane %v5031_v53, 1 }
  0xf2   : > { %3505 = vmatmul.mubr.f32.gmra.mrb[14].mxu0 %v5046_v24  ;;  %3794 = vmatpush3.bf16.msra.mxu1 %v3791_v48  ;;  %v3799_v48 = vpack.c.bf16 %v1211_v41, %v1210_v60  ;;  %v2052_v60 = vld [vmem:[#allocation7 + $0x320] sm:$0xff]  ;;  %v2053_v41 = vld [vmem:[#allocation7 + $0x328] sm:$0xff]  ;;  %vm5106_vm12 = vcmp.lt.s32.totalorder %v391_v3, 15  ;;  %v710_v3 = vrot.slane %v4921_v22, 1 }
  0xf3   : > { %3922 = vmatpush3.bf16.msra.mxu0 %v3919_v55  ;;  %3315 = vmatprep.mubr.f32.mxu1 %v4817_v52  ;;  %v5074_v55 = vsel %vm719_vm8, %v703_v5, %v704_v34  ;;  %v5084_v5 = vsel %vm719_vm8, %v704_v34, %v705_v16  ;;  %v3931_v34 = vpack.c.bf16 %v2053_v41, %v2052_v60  ;;  %v709_v60 = vrot.slane %v4910_v15, 1 }
  0xf4   : > { %3539 = vmatprep.mubr.f32.mxu0 %v5055_v19  ;;  %3796 = vmatprep.subr.bf16.mxu1 %v3795_v17  ;;  %v329_v41 = vadd.s32 88, %v4814_v39 }
  0xf5   : > { %3316 = vmatmul.mubr.f32.vlgmr.msra.gmra.mrb[0].mxu1 %v4833_v14  ;;  %3924 = vmatprep.subr.bf16.mxu0 %v3923_v21 }
  0xf6   : > { %3540 = vmatmul.mubr.msk.f32.vlgmr.msra.gmra.mrb[0].mxu0 %vm5064_vm10, %v5061_v1  ;;  %3798 = vmatpush3.bf16.msra.mxu1 %v3795_v17  ;;  %v3803_v17 = vpack.c.bf16 %v1213_v33, %v1212_v54  ;;  %v5103_v54 = vsel %vm719_vm8, %v706_v25, %v707_v37  ;;  %v405_v33 = vand.u32 15, %v327_v29  ;;  %v1217_v29 = vld [vmem:[#allocation7 + $0x148] sm:$0xff] }
  0xf7   : > { %3926 = vmatpush3.bf16.msra.mxu0 %v3923_v21  ;;  %3318 = vmatprep.mubr.f32.mxu1 %v4823_v56  ;;  %v5095_v21 = vsel %vm719_vm8, %v705_v16, %v706_v25 }
  0xf8   : > { %3542 = vmatprep.mubr.f32.mxu0 %v5074_v55  ;;  %3800 = vmatprep.subr.bf16.mxu1 %v3799_v48  ;;  %vm5128_vm13 = vcmp.lt.s32.totalorder %v405_v33, 15  ;;  %v712_v33 = vrot.slane %v4950_v45, 1 }
  0xf9   : > { %3319 = vmatmul.mubr.f32.gmra.mrb[2].mxu1 %v4837_v23  ;;  %3928 = vmatprep.subr.bf16.mxu0 %v3927_v0  ;;  %v2054_v23 = vld [vmem:[#allocation7 + $0x330] sm:$0xff] }
  0xfa   : > { %3543 = vmatmul.mubr.msk.f32.gmra.mrb[2].mxu0 %vm5086_vm11, %v5084_v5  ;;  %3802 = vmatpush3.bf16.msra.mxu1 %v3799_v48  ;;  %v3807_v48 = vpack.c.bf16 %v1215_v40, %v1214_v47  ;;  %v3935_v25 = vpack.c.bf16 %v2055_v20, %v2054_v23  ;;  %v2056_v40 = vld [vmem:[#allocation7 + $0x340] sm:$0xff]  ;;  %v2057_v47 = vld [vmem:[#allocation7 + $0x348] sm:$0xff]  ;;  %v419_v20 = vand.u32 15, %v329_v41  ;;  %v2058_v41 = vld [vmem:[#allocation7 + $0x350] sm:$0xff] }
  0xfb   : > { %3930 = vmatpush3.bf16.msra.mxu0 %v3927_v0  ;;  %3321 = vmatprep.mubr.f32.mxu1 %v4841_v28  ;;  %v5116_v0 = vsel %vm719_vm8, %v707_v37, %v708_v8  ;;  %v1216_v28 = vld [vmem:[#allocation7 + $0x140] sm:$0xff]  ;;  %v5126_v37 = vsel %vm719_vm8, %v708_v8, %v709_v60  ;;  %v3939_v8 = vpack.c.bf16 %v2057_v47, %v2056_v40  ;;  %v713_v47 = vrot.slane %v4963_v62, 1 }
  0xfc   : > { %3545 = vmatprep.mubr.f32.mxu0 %v5095_v21  ;;  %3804 = vmatprep.subr.bf16.mxu1 %v3803_v17  ;;  %vm5148_vm14 = vcmp.lt.s32.totalorder %v419_v20, 15  ;;  %v714_v20 = vrot.slane %v4987_v13, 1 }
  0xfd   : > { %3322 = vmatmul.mubr.f32.gmra.mrb[4].mxu1 %v4848_v35  ;;  %3932 = vmatprep.subr.bf16.mxu0 %v3931_v34  ;;  %v331_v35 = vadd.s32 104, %v4814_v39 }
  0xfe   : > { %3546 = vmatmul.mubr.msk.f32.gmra.mrb[4].mxu0 %vm5106_vm12, %v5103_v54  ;;  %3806 = vmatpush3.bf16.msra.mxu1 %v3803_v17  ;;  %v3811_v17 = vpack.c.bf16 %v1217_v29, %v1216_v28  ;;  %v5145_v28 = vsel %vm719_vm8, %v710_v3, %v711_v38  ;;  %v2059_v29 = vld [vmem:[#allocation7 + $0x358] sm:$0xff] }
  0xff   : > { %3934 = vmatpush3.bf16.msra.mxu0 %v3931_v34  ;;  %3324 = vmatprep.mubr.f32.mxu1 %v4860_v44  ;;  %v5137_v34 = vsel %vm719_vm8, %v709_v60, %v710_v3  ;;  %v1218_v44 = vld [vmem:[#allocation7 + $0x150] sm:$0xff]  ;;  %v5606_v60 = vmov 0  ;;  %v433_v40 = vand.u32 15, %v331_v35  ;;  %v3943_v3 = vpack.c.bf16 %v2059_v29, %v2058_v41  ;;  %v1221_v35 = vld [vmem:[#allocation7 + $0x168] sm:$0xff] }
 0x100   : > { %3548 = vmatprep.mubr.f32.mxu0 %v5116_v0  ;;  %3808 = vmatprep.subr.bf16.mxu1 %v3807_v48  ;;  %v5607_v60 = vsel %vm5148_vm14, 4294967295, %v5606_v60 }
 0x101   : > { %3325 = vmatmul.mubr.f32.gmra.mrb[6].mxu1 %v4871_v51  ;;  %3936 = vmatprep.subr.bf16.mxu0 %v3935_v25  ;;  %5608 = vst [vmem:[#allocation34_spill] sm:$0xff] %v5607_v60  ;;  %v333_v51 = vadd.s32 120, %v4814_v39  ;;  %vm5170_vm15 = vcmp.lt.s32.totalorder %v433_v40, 15  ;;  %v716_v40 = vrot.slane %v5046_v24, 1  ;;  %v1223_v60 = vld [vmem:[#allocation7 + $0x178] sm:$0xff] }
 0x102   : > { %3549 = vmatmul.mubr.msk.f32.gmra.mrb[6].mxu0 %vm5128_vm13, %v5126_v37  ;;  %3810 = vmatpush3.bf16.msra.mxu1 %v3807_v48  ;;  %v3815_v48 = vpack.c.bf16 %v1219_v11, %v1218_v44  ;;  %v2060_v44 = vld [vmem:[#allocation7 + $0x360] sm:$0xff]  ;;  %v2061_v11 = vld [vmem:[#allocation7 + $0x368] sm:$0xff] }
 0x103   : > { %3938 = vmatpush3.bf16.msra.mxu0 %v3935_v25  ;;  %3327 = vmatprep.mubr.f32.mxu1 %v4885_v63  ;;  %v5158_v25 = vsel %vm719_vm8, %v711_v38, %v712_v33  ;;  %v1220_v63 = vld [vmem:[#allocation7 + $0x160] sm:$0xff]  ;;  %v5168_v38 = vsel %vm719_vm8, %v712_v33, %v713_v47  ;;  %v447_v29 = vand.u32 15, %v333_v51  ;;  %v3947_v33 = vpack.c.bf16 %v2061_v11, %v2060_v44  ;;  %v2062_v51 = vld [vmem:[#allocation7 + $0x370] sm:$0xff] }
 0x104   : > { %3551 = vmatprep.mubr.f32.mxu0 %v5137_v34  ;;  %3812 = vmatprep.subr.bf16.mxu1 %v3811_v17  ;;  %5609 = vst [vmem:[#allocation35_spill] sm:$0xff] %v5158_v25  ;;  %v700_v11 = vrot.slane %v4833_v14, 1  ;;  %v5614_v14 = vrot.slane %v4953_v49, 1 }
 0x105   : > { %3328 = vmatmul.mubr.f32.gmra.mrb[8].mxu1 %v4896_v6  ;;  %3940 = vmatprep.subr.bf16.mxu0 %v3939_v8  ;;  %v335_v6 = vadd.s32 136, %v4814_v39  ;;  %vm5191_vm1 = vcmp.lt.s32.totalorder %v447_v29, 15  ;;  %v1419_v29 = vld [vmem:[#allocation7 + $0x188] sm:$0xff] }
 0x106   : > { %3552 = vmatmul.mubr.msk.f32.gmra.mrb[8].mxu0 %vm5148_vm14, %v5145_v28  ;;  %3814 = vmatpush3.bf16.msra.mxu1 %v3811_v17  ;;  %v3819_v17 = vpack.c.bf16 %v1221_v35, %v1220_v63  ;;  %v319_v63 = vadd.s32 8, %v4814_v39 }
 0x107   : > { %3942 = vmatpush3.bf16.msra.mxu0 %v3939_v8  ;;  %3330 = vmatprep.mubr.f32.mxu1 %v4910_v15  ;;  %v5179_v8 = vsel %vm719_vm8, %v713_v47, %v714_v20  ;;  %v1222_v15 = vld [vmem:[#allocation7 + $0x170] sm:$0xff]  ;;  %v5189_v47 = vsel %vm719_vm8, %v714_v20, %v715_v7  ;;  %v461_v44 = vand.u32 15, %v335_v6 }
 0x108   : > { %3554 = vmatprep.mubr.f32.mxu0 %v5158_v25  ;;  %3816 = vmatprep.subr.bf16.mxu1 %v3815_v48  ;;  %v2063_v25 = vld [vmem:[#allocation7 + $0x378] sm:$0xff]  ;;  %v349_v6 = vand.u32 15, %v319_v63  ;;  %v1420_v63 = vld [vmem:[#allocation7 + $0x190] sm:$0xff] }
 0x109   : > { %3331 = vmatmul.mubr.f32.gmra.mrb[10].mxu1 %v4921_v22  ;;  %3944 = vmatprep.subr.bf16.mxu0 %v3943_v3  ;;  %v3951_v20 = vpack.c.bf16 %v2063_v25, %v2062_v51  ;;  %v2258_v22 = vld [vmem:[#allocation7 + $0x380] sm:$0xff]  ;;  %vm5212_vm0 = vcmp.lt.s32.totalorder %v461_v44, 15  ;;  %v5617_v25 = vrot.slane %v4817_v52, 1  ;;  %v5618_v44 = vrot.slane %v4823_v56, 1 }
 0x10a   : > { %3555 = vmatmul.mubr.msk.f32.gmra.mrb[10].mxu0 %vm5170_vm15, %v5168_v38  ;;  %3818 = vmatpush3.bf16.msra.mxu1 %v3815_v48  ;;  %v3823_v48 = vpack.c.bf16 %v1223_v60, %v1222_v15  ;;  %v2259_v15 = vld [vmem:[#allocation7 + $0x388] sm:$0xff]  ;;  %vm741_vm2 = vcmp.lt.s32.totalorder %v349_v6, 15  ;;  %v2262_v56 = vld [vmem:[#allocation7 + $0x3a0] sm:$0xff] }
 0x10b   : > { %3946 = vmatpush3.bf16.msra.mxu0 %v3943_v3  ;;  %3333 = vmatprep.mubr.f32.mxu1 %v4935_v32  ;;  %v5200_v3 = vsel %vm719_vm8, %v715_v7, %v716_v40  ;;  %v1418_v32 = vld [vmem:[#allocation7 + $0x180] sm:$0xff]  ;;  %v5210_v7 = vsel %vm719_vm8, %v716_v40, %v5614_v14  ;;  %v3955_v51 = vpack.c.bf16 %v2259_v15, %v2258_v22  ;;  %v1421_v40 = vld [vmem:[#allocation7 + $0x198] sm:$0xff]  ;;  %v2260_v14 = vld [vmem:[#allocation7 + $0x390] sm:$0xff] }
 0x10c   : > { %3557 = vmatprep.mubr.f32.mxu0 %v5179_v8  ;;  %3820 = vmatprep.subr.bf16.mxu1 %v3819_v17  ;;  %v737_v52 = vsel %vm719_vm8, %v700_v11, %v5618_v44  ;;  %v3831_v22 = vpack.c.bf16 %v1421_v40, %v1420_v63  ;;  %v1424_v15 = vld [vmem:[#allocation7 + $0x1b0] sm:$0xff]  ;;  %v1427_v63 = vld [vmem:[#allocation7 + $0x1c8] sm:$0xff]  ;;  %v2266_v40 = vld [vmem:[#allocation7 + $0x3c0] sm:$0xff] }
 0x10d   : > { %3334 = vmatmul.mubr.f32.gmra.mrb[12].mxu1 %v4950_v45  ;;  %3948 = vmatprep.subr.bf16.mxu0 %v3947_v33  ;;  %v2267_v44 = vld [vmem:[#allocation7 + $0x3c8] sm:$0xff] }
 0x10e   : > { %3558 = vmatmul.mubr.msk.f32.gmra.mrb[12].mxu0 %vm5191_vm1, %v5189_v47  ;;  %3822 = vmatpush3.bf16.msra.mxu1 %v3819_v17  ;;  %v738_v17 = vsel %vm719_vm8, %v5617_v25, %v700_v11  ;;  %v2261_v25 = vld [vmem:[#allocation7 + $0x398] sm:$0xff]  ;;  %v2263_v11 = vld [vmem:[#allocation7 + $0x3a8] sm:$0xff] }
 0x10f   : > { %3950 = vmatpush3.bf16.msra.mxu0 %v3947_v33  ;;  %3336 = vmatprep.mubr.f32.mxu1 %v4963_v62  ;;  %v3827_v33 = vpack.c.bf16 %v1419_v29, %v1418_v32  ;;  %v3959_v32 = vpack.c.bf16 %v2261_v25, %v2260_v14  ;;  %v1423_v29 = vld [vmem:[#allocation7 + $0x1a8] sm:$0xff]  ;;  %v3963_v6 = vpack.c.bf16 %v2263_v11, %v2262_v56  ;;  %v1428_v25 = vld [vmem:[#allocation7 + $0x1d0] sm:$0xff]  ;;  %v594_v11 = vrot.slane %v5031_v53, 7 }
 0x110   : > { %3560 = vmatprep.mubr.f32.mxu0 %v5200_v3  ;;  %3824 = vmatprep.subr.bf16.mxu1 %v3823_v48  ;;  %v3971_v14 = vpack.c.bf16 %v2267_v44, %v2266_v40  ;;  %v5620_v40 = vrot.slane %v4987_v13, 7 }
 0x111   : > { %3337 = vmatmul.mubr.f32.gmra.mrb[14].mxu1 %v4987_v13  ;;  %3952 = vmatprep.subr.bf16.mxu0 %v3951_v20 }
 0x112   : > { %3561 = vmatmul.mubr.msk.f32.gmra.mrb[14].mxu0 %vm5212_vm0, %v5210_v7  ;;  %3826 = vmatpush3.bf16.msra.mxu1 %v3823_v48  ;;  %v1422_v48 = vld [vmem:[#allocation7 + $0x1a0] sm:$0xff] }
 0x113   : > { %3954 = vmatpush3.bf16.msra.mxu0 %v3951_v20  ;;  %3371 = vmatprep.mubr.f32.mxu1 %v738_v17  ;;  %v3835_v20 = vpack.c.bf16 %v1423_v29, %v1422_v48  ;;  %v1425_v17 = vld [vmem:[#allocation7 + $0x1b8] sm:$0xff]  ;;  %v2268_v48 = vld [vmem:[#allocation7 + $0x3d0] sm:$0xff] }
 0x114   : > { %3595 = vmatprep.mubr.msk.f32.mxu0 %vm4879_vm3, %v4877_v58  ;;  %3828 = vmatprep.subr.bf16.mxu1 %v3827_v33  ;;  %v2269_v29 = vld [vmem:[#allocation7 + $0x3d8] sm:$0xff] }
 0x115   : > { %3372 = vmatmul.mubr.msk.f32.vlgmr.msra.gmra.mrb[0].mxu1 %vm741_vm2, %v737_v52  ;;  %3956 = vmatprep.subr.bf16.mxu0 %v3955_v51  ;;  %vm5621_vm2 = vcmp.lt.s32.totalorder %v4814_v39, 1 }
 0x116   : > { %3596 = vmatmul.mubr.f32.vlgmr.msra.gmra.mrb[0].mxu0 %v4890_v2  ;;  %3830 = vmatpush3.bf16.msra.mxu1 %v3827_v33  ;;  %v2264_v33 = vld [vmem:[#allocation7 + $0x3b0] sm:$0xff]  ;;  %v5280_v44 = vsel %vm5621_vm2, %v5620_v40, %v594_v11 }
 0x117   : > { %3958 = vmatpush3.bf16.msra.mxu0 %v3955_v51  ;;  %3374 = vmatprep.mubr.f32.mxu1 %v5055_v19  ;;  %v2265_v51 = vld [vmem:[#allocation7 + $0x3b8] sm:$0xff]  ;;  %v3839_v19 = vpack.c.bf16 %v1425_v17, %v1424_v15  ;;  %v1430_v15 = vld [vmem:[#allocation7 + $0x1e0] sm:$0xff]  ;;  %v1431_v17 = vld [vmem:[#allocation7 + $0x1e8] sm:$0xff] }
 0x118   : > { %3598 = vmatprep.mubr.msk.f32.mxu0 %vm4904_vm4, %v4902_v9  ;;  %3832 = vmatprep.subr.bf16.mxu1 %v3831_v22  ;;  %v3967_v61 = vpack.c.bf16 %v2265_v51, %v2264_v33  ;;  %v336_v33 = vadd.s32 144, %v4814_v39  ;;  %v2270_v51 = vld [vmem:[#allocation7 + $0x3e0] sm:$0xff] }
 0x119   : > { %3375 = vmatmul.mubr.msk.f32.gmra.mrb[2].mxu1 %vm5064_vm10, %v5061_v1  ;;  %3960 = vmatprep.subr.bf16.mxu0 %v3959_v32  ;;  %v1426_v1 = vld [vmem:[#allocation7 + $0x1c0] sm:$0xff]  ;;  %vm5626_vm10 = vmmov %vm5621_vm2 }
 0x11a   : > { %3599 = vmatmul.mubr.f32.gmra.mrb[2].mxu0 %v4915_v18  ;;  %3834 = vmatpush3.bf16.msra.mxu1 %v3831_v22  ;;  %v3843_v52 = vpack.c.bf16 %v1427_v63, %v1426_v1  ;;  %v1429_v22 = vld [vmem:[#allocation7 + $0x1d8] sm:$0xff]  ;;  %v3851_v1 = vpack.c.bf16 %v1431_v17, %v1430_v15  ;;  %v5619_v63 = vld [vmem:[#allocation34_spill] sm:$0xff]  ;;  %v5625_v17 = vld [vmem:[#allocation35_spill] sm:$0xff] }
 0x11b   : > { %3962 = vmatpush3.bf16.msra.mxu0 %v3959_v32  ;;  %3377 = vmatprep.mubr.f32.mxu1 %v5074_v55  ;;  %v334_v32 = vadd.s32 128, %v4814_v39  ;;  %v3847_v56 = vpack.c.bf16 %v1429_v22, %v1428_v25  ;;  %v468_v25 = vand.u32 15, %v336_v33  ;;  %v1432_v22 = vld [vmem:[#allocation7 + $0x1f0] sm:$0xff]  ;;  %v2273_v15 = vld [vmem:[#allocation7 + $0x3f8] sm:$0xff] }
 0x11c   : > { %3601 = vmatprep.mubr.msk.f32.mxu0 %vm4929_vm5, %v4927_v26  ;;  %3836 = vmatprep.subr.bf16.mxu1 %v3835_v20 }
 0x11d   : > { %3378 = vmatmul.mubr.msk.f32.gmra.mrb[4].mxu1 %vm5086_vm11, %v5084_v5  ;;  %3964 = vmatprep.subr.bf16.mxu0 %v3963_v6 }
 0x11e   : > { %3602 = vmatmul.mubr.f32.gmra.mrb[4].mxu0 %v4940_v36  ;;  %3838 = vmatpush3.bf16.msra.mxu1 %v3835_v20  ;;  %v3975_v20 = vpack.c.bf16 %v2269_v29, %v2268_v48  ;;  %v5624_v48 = vld [vmem:[#allocation33_spill] sm:$0xff]  ;;  %v2272_v29 = vld [vmem:[#allocation7 + $0x3f0] sm:$0xff] }
 0x11f   : > { %3966 = vmatpush3.bf16.msra.mxu0 %v3963_v6  ;;  %3380 = vmatprep.mubr.f32.mxu1 %v5095_v21  ;;  %v454_v6 = vand.u32 15, %v334_v32  ;;  %v1433_v32 = vld [vmem:[#allocation7 + $0x1f8] sm:$0xff]  ;;  %v3983_v33 = vpack.c.bf16 %v2273_v15, %v2272_v29  ;;  %v5633_v15 = vld [vmem:[#allocation23_spill] sm:$0xff] }
 0x120   : > { %3604 = vmatprep.mubr.msk.f32.mxu0 %vm4946_vm6, %v4958_v50  ;;  %3840 = vmatprep.subr.bf16.mxu1 %v3839_v19  ;;  %v5630_v29 = vld [vmem:[#allocation21_spill] sm:$0xff] }
 0x121   : > { %3381 = vmatmul.mubr.msk.f32.gmra.mrb[6].mxu1 %vm5106_vm12, %v5103_v54  ;;  %3968 = vmatprep.subr.bf16.mxu0 %v3967_v61  ;;  %vm5282_vm8 = vcmp.ge.s32.totalorder %v454_v6, 1  ;;  %v3855_v6 = vpack.c.bf16 %v1433_v32, %v1432_v22  ;;  %v2470_v22 = vld [vmem:[#allocation7 + $0x410] sm:$0xff] }
 0x122   : > { %3605 = vmatmul.mubr.f32.gmra.mrb[6].mxu0 %v4969_v4  ;;  %3842 = vmatpush3.bf16.msra.mxu1 %v3839_v19  ;;  %v2271_v19 = vld [vmem:[#allocation7 + $0x3e8] sm:$0xff]  ;;  %v5629_v32 = vld [vmem:[#allocation20_spill] sm:$0xff] }
 0x123   : > { %3970 = vmatpush3.bf16.msra.mxu0 %v3967_v61  ;;  %3383 = vmatprep.mubr.f32.mxu1 %v5116_v0  ;;  %v595_v61 = vrot.slane %v5046_v24, 7 }
 0x124   : > { %3607 = vmatprep.mubr.msk.f32.mxu0 %vm4983_vm7, %v4994_v57  ;;  %3844 = vmatprep.subr.bf16.mxu1 %v3843_v52 }
 0x125   : > { %3384 = vmatmul.mubr.msk.f32.gmra.mrb[8].mxu1 %vm5128_vm13, %v5126_v37  ;;  %3972 = vmatprep.subr.bf16.mxu0 %v3971_v14  ;;  %v5290_v40 = vsel %vm5626_vm10, %v594_v11, %v595_v61  ;;  %v2468_v11 = vld [vmem:[#allocation7 + $0x400] sm:$0xff]  ;;  %vm5631_vm10 = vnez %v5630_v29  ;;  %v5640_v29 = vld [vmem:[#allocation28_spill] sm:$0xff] }
 0x126   : > { %3608 = vmatmul.mubr.f32.gmra.mrb[8].mxu0 %v5008_v30  ;;  %3846 = vmatpush3.bf16.msra.mxu1 %v3843_v52 }
 0x127   : > { %3974 = vmatpush3.bf16.msra.mxu0 %v3971_v14  ;;  %3386 = vmatprep.mubr.f32.mxu1 %v5137_v34  ;;  %v3979_v14 = vpack.c.bf16 %v2271_v19, %v2270_v51  ;;  %v2469_v51 = vld [vmem:[#allocation7 + $0x408] sm:$0xff] }
 0x128   : > { %3610 = vmatprep.mubr.msk.f32.mxu0 %vm5026_vm9, %v5024_v42  ;;  %3848 = vmatprep.subr.bf16.mxu1 %v3847_v56  ;;  %v3987_v19 = vpack.c.bf16 %v2469_v51, %v2468_v11  ;;  %v5634_v11 = vld [vmem:[#allocation19_spill] sm:$0xff] }
 0x129   : > { %3387 = vmatmul.mubr.msk.f32.gmra.mrb[10].mxu1 %vm5148_vm14, %v5145_v28  ;;  %3976 = vmatprep.subr.bf16.mxu0 %v3975_v20  ;;  %vm637_vm14 = vcmp.ge.s32.totalorder %v468_v25, 1  ;;  %v5628_v25 = vld [vmem:[#allocation30_spill] sm:$0xff]  ;;  %v2474_v51 = vld [vmem:[#allocation7 + $0x430] sm:$0xff] }
 0x12a   : > { %3611 = vmatmul.mubr.f32.gmra.mrb[10].mxu0 %v5624_v48  ;;  %3850 = vmatpush3.bf16.msra.mxu1 %v3847_v56  ;;  %v5627_v56 = vrot.slane %v4953_v49, 7 }
 0x12b   : > { %3978 = vmatpush3.bf16.msra.mxu0 %v3975_v20  ;;  %3389 = vmatprep.mubr.f32.mxu1 %v5625_v17 }
 0x12c   : > { %3613 = vmatprep.mubr.msk.f32.mxu0 %vm5282_vm8, %v5280_v44  ;;  %3852 = vmatprep.subr.bf16.mxu1 %v3851_v1  ;;  %v600_v20 = vsel %vm5621_vm2, %v595_v61, %v5627_v56  ;;  %v2471_v61 = vld [vmem:[#allocation7 + $0x418] sm:$0xff]  ;;  %v2472_v56 = vld [vmem:[#allocation7 + $0x420] sm:$0xff] }
 0x12d   : > { %3390 = vmatmul.mubr.msk.f32.gmra.mrb[12].mxu1 %vm5170_vm15, %v5168_v38  ;;  %3980 = vmatprep.subr.bf16.mxu0 %v3979_v14 }
 0x12e   : > { %3614 = vmatmul.mubr.f32.gmra.mrb[12].mxu0 %v5290_v40  ;;  %3854 = vmatpush3.bf16.msra.mxu1 %v3851_v1  ;;  %v5632_v1 = vld [vmem:[#allocation18_spill] sm:$0xff] }
 0x12f   : > { %3982 = vmatpush3.bf16.msra.mxu0 %v3979_v14  ;;  %3392 = vmatprep.mubr.f32.mxu1 %v5179_v8  ;;  %v3991_v14 = vpack.c.bf16 %v2471_v61, %v2470_v22  ;;  %v2475_v22 = vld [vmem:[#allocation7 + $0x438] sm:$0xff] }
 0x130   : > { %3616 = vmatprep.mubr.msk.f32.mxu0 %vm637_vm14, %v600_v20  ;;  %3856 = vmatprep.subr.bf16.mxu1 %v3855_v6  ;;  %v2473_v20 = vld [vmem:[#allocation7 + $0x428] sm:$0xff]  ;;  %v5636_v61 = vld [vmem:[#allocation24_spill] sm:$0xff] }
 0x131   : > { %3393 = vmatmul.mubr.msk.f32.gmra.mrb[14].mxu1 %vm5191_vm1, %v5189_v47  ;;  %3984 = vmatprep.subr.bf16.mxu0 %v3983_v33 }
 0x132   : > { %3617 = vmatmul.mubr.f32.gmra.mrb[14].mxu0 %v5628_v25  ;;  %3858 = vmatpush3.bf16.msra.mxu1 %v3855_v6  ;;  %v5635_v6 = vld [vmem:[#allocation22_spill] sm:$0xff] }
 0x133   : > { %3986 = vmatpush3.bf16.msra.mxu0 %v3983_v33  ;;  %3427 = vmatprep.mubr.msk.f32.mxu1 %vm5631_vm10, %v5629_v32  ;;  %v3995_v33 = vpack.c.bf16 %v2473_v20, %v2472_v56  ;;  %v5638_v25 = vld [vmem:[#allocation26_spill] sm:$0xff]  ;;  %v5639_v32 = vld [vmem:[#allocation27_spill] sm:$0xff] }
 0x134   : > { %3651 = vmatprep.mubr.f32.mxu0 %v5632_v1  ;;  %3988 = vmatprep.subr.bf16.mxu0 %v3987_v19  ;;  %v5641_v1 = vld [vmem:[#allocation29_spill] sm:$0xff] }
 0x135   : > { %3428 = vmatmul.mubr.f32.vlgmr.msra.gmra.mrb[0].mxu1 %v5633_v15  ;;  %4019 = vmatprep.subr.bf16.mxu1 %v3987_v19  ;;  %v5394_v15 = vld [vmem:[#allocation9] ss:$0 sm:$0xff] }
 0x136   : > { %3652 = vmatmul.mubr.f32.vlgmr.msra.gmra.mrb[0].mxu0 %v5634_v11  ;;  %4027 = vmatpush3.bf16.msra.mxu1 %v3987_v19 }
 0x137   : > { %3990 = vmatpush3.bf16.msra.mxu0 %v3987_v19  ;;  %3430 = vmatprep.mubr.msk.f32.mxu1 %vm4879_vm3, %v4877_v58  ;;  %v5637_v19 = vld [vmem:[#allocation25_spill] sm:$0xff]  ;;  %v3999_v58 = vpack.c.bf16 %v2475_v22, %v2474_v51 }
 0x138   : > { %3654 = vmatprep.mubr.f32.mxu0 %v5635_v6  ;;  %3992 = vmatprep.subr.bf16.mxu0 %v3991_v14 }
 0x139   : > { %3431 = vmatmul.mubr.f32.gmra.mrb[2].mxu1 %v4890_v2  ;;  %4020 = vmatprep.subr.bf16.mxu1 %v3991_v14  ;;  %v2477_v2 = vld [vmem:[#allocation7 + $0x448] sm:$0xff] }
 0x13a   : > { %3655 = vmatmul.mubr.f32.gmra.mrb[2].mxu0 %v5636_v61  ;;  %4028 = vmatpush3.bf16.msra.mxu1 %v3991_v14 }
 0x13b   : > { %3994 = vmatpush3.bf16.msra.mxu0 %v3991_v14  ;;  %3433 = vmatprep.mubr.msk.f32.mxu1 %vm4904_vm4, %v4902_v9  ;;  %v4003_v9 = vpack.c.bf16 %v2477_v2, %v2476_v59  ;;  %vm5644_vm4 = vnez %v5619_v63 }
 0x13c   : > { %3657 = vmatprep.mubr.f32.mxu0 %v5637_v19  ;;  %3996 = vmatprep.subr.bf16.mxu0 %v3995_v33 }
 0x13d   : > { %3434 = vmatmul.mubr.f32.gmra.mrb[4].mxu1 %v4915_v18  ;;  %4021 = vmatprep.subr.bf16.mxu1 %v3995_v33  ;;  %v2479_v18 = vld [vmem:[#allocation7 + $0x458] sm:$0xff] }
 0x13e   : > { %3658 = vmatmul.mubr.f32.gmra.mrb[4].mxu0 %v5638_v25  ;;  %4029 = vmatpush3.bf16.msra.mxu1 %v3995_v33 }
 0x13f   : > { %3998 = vmatpush3.bf16.msra.mxu0 %v3995_v33  ;;  %3436 = vmatprep.mubr.msk.f32.mxu1 %vm4929_vm5, %v4927_v26  ;;  %v4007_v26 = vpack.c.bf16 %v2479_v18, %v2478_v10 }
 0x140   : > { %3660 = vmatprep.mubr.f32.mxu0 %v5639_v32  ;;  %4000 = vmatprep.subr.bf16.mxu0 %v3999_v58 }
 0x141   : > { %3437 = vmatmul.mubr.f32.gmra.mrb[6].mxu1 %v4940_v36  ;;  %4022 = vmatprep.subr.bf16.mxu1 %v3999_v58  ;;  %v2481_v36 = vld [vmem:[#allocation7 + $0x468] sm:$0xff] }
 0x142   : > { %3661 = vmatmul.mubr.f32.gmra.mrb[6].mxu0 %v5640_v29  ;;  %4030 = vmatpush3.bf16.msra.mxu1 %v3999_v58  ;;  %v4011_v43 = vpack.c.bf16 %v2481_v36, %v2480_v27 }
 0x143   : > { %4002 = vmatpush3.bf16.msra.mxu0 %v3999_v58  ;;  %3439 = vmatprep.mubr.msk.f32.mxu1 %vm4946_vm6, %v4958_v50  ;;  %v2482_v50 = vld [vmem:[#allocation7 + $0x470] sm:$0xff] }
 0x144   : > { %3663 = vmatprep.mubr.f32.mxu0 %v5641_v1  ;;  %4004 = vmatprep.subr.bf16.mxu0 %v4003_v9 }
 0x145   : > { %3440 = vmatmul.mubr.f32.gmra.mrb[8].mxu1 %v4969_v4  ;;  %4023 = vmatprep.subr.bf16.mxu1 %v4003_v9  ;;  %v2483_v4 = vld [vmem:[#allocation7 + $0x478] sm:$0xff] }
 0x146   : > { %3664 = vmatmul.mubr.f32.gmra.mrb[8].mxu0 %v4950_v45  ;;  %4031 = vmatpush3.bf16.msra.mxu1 %v4003_v9  ;;  %v4015_v45 = vpack.c.bf16 %v2483_v4, %v2482_v50 }
 0x147   : > { %4006 = vmatpush3.bf16.msra.mxu0 %v4003_v9  ;;  %3442 = vmatprep.mubr.msk.f32.mxu1 %vm4983_vm7, %v4994_v57 }
 0x148   : > { %3666 = vmatprep.mubr.f32.mxu0 %v4963_v62  ;;  %4008 = vmatprep.subr.bf16.mxu0 %v4007_v26  ;;  %v4292_v62 = vld [vmem:[#allocation2 + $0x98] sm:$0xff] }
 0x149   : > { %3443 = vmatmul.mubr.f32.gmra.mrb[10].mxu1 %v5008_v30  ;;  %4024 = vmatprep.subr.bf16.mxu1 %v4007_v26 }
 0x14a   : > { %3667 = vmatmul.mubr.f32.gmra.mrb[10].mxu0 %v4987_v13  ;;  %4032 = vmatpush3.bf16.msra.mxu1 %v4007_v26  ;;  %v5643_v13 = vld [vmem:[#allocation32_spill] sm:$0xff] }
 0x14b   : > { %4010 = vmatpush3.bf16.msra.mxu0 %v4007_v26  ;;  %3445 = vmatprep.mubr.msk.f32.mxu1 %vm5026_vm9, %v5024_v42 }
 0x14c   : > { %3669 = vmatprep.mubr.f32.mxu0 %v5031_v53  ;;  %4012 = vmatprep.subr.bf16.mxu0 %v4011_v43 }
 0x14d   : > { %3446 = vmatmul.mubr.f32.gmra.mrb[12].mxu1 %v5624_v48  ;;  %4025 = vmatprep.subr.bf16.mxu1 %v4011_v43 }
 0x14e   : > { %3670 = vmatmul.mubr.f32.gmra.mrb[12].mxu0 %v5046_v24  ;;  %4033 = vmatpush3.bf16.msra.mxu1 %v4011_v43 }
 0x14f   : > { %4014 = vmatpush3.bf16.msra.mxu0 %v4011_v43  ;;  %3448 = vmatprep.mubr.msk.f32.mxu1 %vm5282_vm8, %v5280_v44 }
 0x150   : > { %3672 = vmatprep.mubr.f32.mxu0 %v4953_v49  ;;  %4016 = vmatprep.subr.bf16.mxu0 %v4015_v45  ;;  %v337_v49 = vadd.s32 152, %v4814_v39  ;;  %v5642_v39 = vld [vmem:[#allocation31_spill] sm:$0xff] }
 0x151   : > { %3449 = vmatmul.mubr.f32.gmra.mrb[14].mxu1 %v5290_v40  ;;  %4026 = vmatprep.subr.bf16.mxu1 %v4015_v45 }
 0x152   : > { %3673 = vmatmul.mubr.f32.gmra.mrb[14].mxu0 %v4292_v62  ;;  %4034 = vmatpush3.bf16.msra.mxu1 %v4015_v45  ;;  %v475_v12 = vand.u32 15, %v337_v49 }
 0x153   : > { %4018 = vmatpush3.bf16.msra.mxu0 %v4015_v45  ;;  %3707 = vmatprep.mubr.f32.mxu0 %v5074_v55 }
 0x154   : > { %3719 = vmatprep.mubr.f32.mxu1 %v5625_v17  ;;  %vm759_vm3 = vcmp.lt.s32.totalorder %v475_v12, 15 }
 0x155   : > { %3720 = vmatmul.mubr.msk.f32.vlgmr.msra.gmra.mrb[16].mxu1 %vm5170_vm15, %v5168_v38 }
 0x156   : > { %3708 = vmatmul.mubr.msk.f32.vlgmr.msra.gmra.mrb[0].mxu0 %vm5086_vm11, %v5084_v5  ;;  %3722 = vmatprep.mubr.f32.mxu1 %v5179_v8 }
 0x157   : > { %3710 = vmatprep.mubr.f32.mxu0 %v5095_v21 }
 0x159   : > { %3723 = vmatmul.mubr.msk.f32.gmra.mrb[18].mxu1 %vm5191_vm1, %v5189_v47 }
 0x15a   : > { %3711 = vmatmul.mubr.msk.f32.gmra.mrb[2].mxu0 %vm5106_vm12, %v5103_v54  ;;  %3725 = vmatprep.mubr.f32.mxu1 %v5200_v3 }
 0x15b   : > { %3713 = vmatprep.mubr.f32.mxu0 %v5116_v0 }
 0x15d   : > { %3726 = vmatmul.mubr.msk.f32.gmra.mrb[20].mxu1 %vm5212_vm0, %v5210_v7 }
 0x15e   : > { %3714 = vmatmul.mubr.msk.f32.gmra.mrb[4].mxu0 %vm5128_vm13, %v5126_v37  ;;  %3728 = vmatprep.mubr.f32.mxu1 %v5642_v39 }
 0x15f   : > { %3716 = vmatprep.mubr.f32.mxu0 %v5137_v34 }
 0x161   : > { %3729 = vmatmul.mubr.msk.f32.gmra.mrb[22].mxu1 %vm759_vm3, %v5643_v13 }
 0x162   : > { %3717 = vmatmul.mubr.msk.f32.gmra.mrb[6].mxu0 %vm5644_vm4, %v5145_v28 }
 0x208   : > { %v3429_v57 = vpop.f32.mrb[0].mxu1 }
 0x209   : > { %v1500_v30 = vpop.f32.mrb[1].mxu1 }
 0x20c   : > { %v3432_v42 = vpop.f32.mrb[2].mxu1 }
 0x20d   : > { %v1510_v46 = vpop.f32.mrb[3].mxu1 }
 0x210   : > { %v5386_v53 = vpop.f32.mrb[4].mxu1 }
 0x211   : > { %v5388_v24 = vpop.f32.mrb[5].mxu1 }
 0x214   : > { %v5390_v55 = vpop.f32.mrb[6].mxu1 }
 0x215   : > { %v5392_v5 = vpop.f32.mrb[7].mxu1 }
 0x218   : > { %v3441_v31 = vpop.f32.mrb[8].mxu1 }
 0x219   : > { %v3665_v21 = vpop.f32.mrb[8].mxu0  ;;  %v1540_v54 = vpop.f32.mrb[9].mxu1 }
 0x21a   : > { %v4043_v16 = vadd.f32 %v3665_v21, %v3441_v31  ;;  %v2380_v0 = vpop.f32.mrb[9].mxu0 }
 0x21b   : > { %v4045_v37 = vadd.f32 %v2380_v0, %v1540_v54 }
 0x21c   : > { %v3444_v23 = vpop.f32.mrb[10].mxu1 }
 0x21d   : > { %v3668_v34 = vpop.f32.mrb[10].mxu0  ;;  %v1550_v28 = vpop.f32.mrb[11].mxu1 }
 0x21e   : > { %v4047_v38 = vadd.f32 %v3668_v34, %v3444_v23  ;;  %v2390_v41 = vpop.f32.mrb[11].mxu0 }
 0x21f   : > { %v4049_v8 = vadd.f32 %v2390_v41, %v1550_v28 }
 0x220   : > { %v3447_v47 = vpop.f32.mrb[12].mxu1 }
 0x221   : > { %v3671_v35 = vpop.f32.mrb[12].mxu0  ;;  %v1560_v3 = vpop.f32.mrb[13].mxu1 }
 0x222   : > { %v4051_v7 = vadd.f32 %v3671_v35, %v3447_v47  ;;  %v2400_v60 = vpop.f32.mrb[13].mxu0 }
 0x223   : > { %v4053_v63 = vadd.f32 %v2400_v60, %v1560_v3 }
 0x224   : > { %v3450_v44 = vpop.f32.mrb[14].mxu1 }
 0x225   : > { %v3674_v52 = vpop.f32.mrb[14].mxu0  ;;  %v1570_v48 = vpop.f32.mrb[15].mxu1 }
 0x226   : > { %v4055_v17 = vadd.f32 %v3674_v52, %v3450_v44  ;;  %v2410_v40 = vpop.f32.mrb[15].mxu0 }
 0x227   : > { %v4057_v14 = vadd.f32 %v2410_v40, %v1570_v48 }
 0x228   : > { %v3721_v56 = vpop.f32.mrb[16].mxu1 }
 0x229   : > { %v3709_v20 = vpop.f32.mrb[0].mxu0  ;;  %v4044_v11 = vadd.f32 %v4043_v16, %v3721_v56  ;;  %v2590_v6 = vpop.f32.mrb[17].mxu1 }
 0x22a   : > { %v4035_v33 = vadd.f32 %v3709_v20, %v3429_v57  ;;  %v2550_v51 = vpop.f32.mrb[1].mxu0  ;;  %v4046_v22 = vadd.f32 %v4045_v37, %v2590_v6 }
 0x22b   : > { %v2709_v61 = vadd.f32 %v4044_v11, %v5394_v15  ;;  %v4036_v19 = vadd.f32 %v2550_v51, %v1500_v30 }
 0x22c   : > { %v2701_v58 = vadd.f32 %v4035_v33, %v5394_v15  ;;  %v2708_v59 = vadd.f32 %v4046_v22, %v5394_v15  ;;  %v3724_v2 = vpop.f32.mrb[18].mxu1 }
 0x22d   : > { %2725 = vst [vmem:[%s4802_s25 + $0x48] sm:$0xff] %v2709_v61  ;;  %v2700_v25 = vadd.f32 %v4036_v19, %v5394_v15  ;;  %v3712_v32 = vpop.f32.mrb[2].mxu0  ;;  %v4048_v9 = vadd.f32 %v4047_v38, %v3724_v2  ;;  %v2600_v10 = vpop.f32.mrb[19].mxu1 }
 0x22e   : > { %2717 = vst [vmem:[%s4802_s25 + $0x8] sm:$0xff] %v2701_v58  ;;  %2724 = vst [vmem:[%s4802_s25 + $0x40] sm:$0xff] %v2708_v59  ;;  %v4037_v18 = vadd.f32 %v3712_v32, %v3432_v42  ;;  %v2560_v29 = vpop.f32.mrb[3].mxu0  ;;  %v4050_v1 = vadd.f32 %v4049_v8, %v2600_v10 }
 0x22f   : > { %2716 = vst [vmem:[%s4802_s25] sm:$0xff] %v2700_v25  ;;  %v2711_v26 = vadd.f32 %v4048_v9, %v5394_v15  ;;  %v4038_v27 = vadd.f32 %v2560_v29, %v1510_v46 }
 0x230   : > { %v2703_v36 = vadd.f32 %v4037_v18, %v5394_v15  ;;  %v2710_v43 = vadd.f32 %v4050_v1, %v5394_v15  ;;  %v3727_v50 = vpop.f32.mrb[20].mxu1 }
 0x231   : > { %2727 = vst [vmem:[%s4802_s25 + $0x58] sm:$0xff] %v2711_v26  ;;  %v2702_v4 = vadd.f32 %v4038_v27, %v5394_v15  ;;  %v3715_v45 = vpop.f32.mrb[4].mxu0  ;;  %v4052_v62 = vadd.f32 %v4051_v7, %v3727_v50  ;;  %v2610_v49 = vpop.f32.mrb[21].mxu1 }
 0x232   : > { %2719 = vst [vmem:[%s4802_s25 + $0x18] sm:$0xff] %v2703_v36  ;;  %2726 = vst [vmem:[%s4802_s25 + $0x50] sm:$0xff] %v2710_v43  ;;  %v4039_v12 = vadd.f32 %v3715_v45, %v5386_v53  ;;  %v2570_v39 = vpop.f32.mrb[5].mxu0  ;;  %v4054_v13 = vadd.f32 %v4053_v63, %v2610_v49 }
 0x233   : > { %2718 = vst [vmem:[%s4802_s25 + $0x10] sm:$0xff] %v2702_v4  ;;  %v2713_v57 = vadd.f32 %v4052_v62, %v5394_v15  ;;  %v4040_v30 = vadd.f32 %v2570_v39, %v5388_v24 }
 0x234   : > { %v2705_v42 = vadd.f32 %v4039_v12, %v5394_v15  ;;  %v2712_v46 = vadd.f32 %v4054_v13, %v5394_v15  ;;  %v3730_v31 = vpop.f32.mrb[22].mxu1 }
 0x235   : > { %2729 = vst [vmem:[%s4802_s25 + $0x68] sm:$0xff] %v2713_v57  ;;  %v2704_v53 = vadd.f32 %v4040_v30, %v5394_v15  ;;  %v3718_v21 = vpop.f32.mrb[6].mxu0  ;;  %v4056_v54 = vadd.f32 %v4055_v17, %v3730_v31  ;;  %v2620_v16 = vpop.f32.mrb[23].mxu1 }
 0x236   : > { %2721 = vst [vmem:[%s4802_s25 + $0x28] sm:$0xff] %v2705_v42  ;;  %2728 = vst [vmem:[%s4802_s25 + $0x60] sm:$0xff] %v2712_v46  ;;  %v4041_v24 = vadd.f32 %v3718_v21, %v5390_v55  ;;  %v2580_v0 = vpop.f32.mrb[7].mxu0  ;;  %v4058_v37 = vadd.f32 %v4057_v14, %v2620_v16 }
 0x237   : > { %2720 = vst [vmem:[%s4802_s25 + $0x20] sm:$0xff] %v2704_v53  ;;  %v2715_v23 = vadd.f32 %v4056_v54, %v5394_v15  ;;  %v4042_v34 = vadd.f32 %v2580_v0, %v5392_v5 }
 0x238   : > { %v2707_v28 = vadd.f32 %v4041_v24, %v5394_v15  ;;  %v2714_v38 = vadd.f32 %v4058_v37, %v5394_v15 }
 0x239   : > { %2731 = vst [vmem:[%s4802_s25 + $0x78] sm:$0xff] %v2715_v23  ;;  %v2706_v55 = vadd.f32 %v4042_v34, %v5394_v15 }
 0x23a   : > { %2723 = vst [vmem:[%s4802_s25 + $0x38] sm:$0xff] %v2707_v28  ;;  %2730 = vst [vmem:[%s4802_s25 + $0x70] sm:$0xff] %v2714_v38 }
 0x23b   : > { %2722 = vst [vmem:[%s4802_s25 + $0x30] sm:$0xff] %v2706_v55 }
 0x23c   : > { %4392 = shalt.err (!%p4389_p6)
}
 0x23d   : > { %s4393_s20 = scalar_lea.hbm %s5433_s1, 2048  ;;  %s4397_s25 = scalar_lea.hbm %s5508_s3, 8192 }
 0x23e   : > { %p4394_p10 = scmp.ne.s32.totalorder %s5433_s1, %s4393_s20  ;;  %p4398_p3 = scmp.lt.u32.totalorder %s5433_s1, %s5508_s3 }
 0x23f   : > { %p4399_p7 = scmp.lt.u32.totalorder %s4397_s25, %s4393_s20  ;;  %p4401_p9 = scmp.lt.u32.totalorder %s4393_s20, %s5433_s1 }
 0x240   : > { %p4395_p1 = pnand %p4394_p10, %p5645_p11 }
 0x241   : > { %p4400_p13 = por %p4399_p7, %p4398_p3 }
 0x242   : > { %p4396_p4 = pneg %p4395_p1 }
 0x243   : > { %p4402_p0 = por %p4401_p9, %p4400_p13 }
 0x245   : > { %p4403_p5 = pnand %p4402_p0, %p4396_p4 }
 0x247   : > { %4406 = shalt.err (!%p4403_p5)
}
 0x248   : > { %s4515_s8 = smov 128   ;;  %s4516_s26 = smov 8  }
 0x249   : > { %4173 = dma.vmem_to_hbm [thread:$0]  (%p5645_p11), %s5435_s12, 2048, %s5433_s1, %s5444_s11, %s4515_s8, %s4515_s8, %s4516_s26  }
 0x24a PF: > { %s5646_s18 = sld [smem:[#allocation14_spill]]  ;;  %s5647_s19 = sld [smem:[#allocation16_spill]] }
 0x24b   : > { %p4195_p8 = scmp.ge.s32.totalorder %s4505_s22, 2 }
 0x250   : > { %s2763_s29 = sand.u32 1, %s5646_s18   ;;  %p5648_p12 = scmp.ne.s32.totalorder %s5647_s19, 0 }
 0x251   : > { %s2764_s6 = scalar_lea.sflag [#allocation6], %s2763_s29 }
 0x252   : > { %p4187_p2 = pnand %p4195_p8, %p5648_p12 }
 0x254   : > { %4460 = dma.done.wait (!%p4187_p2), %s2764_s6, 2048  }
 0x255   : > { %4462 = vsyncadd (!%p4187_p2), %s2764_s6, 4294965248  ;;  %s20_s22 = sadd.s32 1, %s4505_s22   ;;  %s5649_s18 = sld [smem:[#allocation15_spill]] }
 0x256   : > { %p17_p6 = scmp.ge.s32.totalorder %s20_s22, 6   ;;  %s5650_s20 = sld [smem:[#allocation17_spill]] }
 0x257   : > { %s5651_s28 = smov %s5665_s15  ;;  %s5652_s12 = smov %s4469_s13 }
 0x258   : > { %s5653_s13 = smov %s4473_s14  ;;  %s5654_s14 = smov %s4716_s2 }
 0x259   : > { %s5655_s15 = smov %s4481_s16  ;;  %s5656_s16 = smov %s4485_s17 }
 0x25a   : > { %s5657_s17 = smov %s4711_s10  ;;  %s5658_s19 = smov %s4501_s21 }
 0x25b   : > { %s5659_s21 = smov %s5651_s28  ;;  %19 = sbr.rel (!%p17_p6) target bundleno = 13 (0xd), region = 112 }
 0x262   :  { %2769 = vsyncpa [#allocation5], 1 }
 0x263   :  { %2771 = vsyncpa [#allocation5 + $0x1], 1 }
 0x264   :  { %2772 = vsyncpa [#allocation8], 1 }
 0x265   :  { %2773 = vsyncpa [#allocation6], 1 }
 0x266   :  { %2775 = vsyncpa [#allocation6 + $0x1], 1 }

</bundles_post_ra>
